<compile_context>
chip_gen: v7x
topology: tpu7x:2x2x1
jax: 0.10.0
libtpu: 0.0.40
codegen_flags: <defaults>
</compile_context>

<pallas_src>
import jax
import jax.numpy as jnp
import numpy as np
from jax.experimental import pallas as pl
from jax.experimental.pallas import tpu as pltpu


# ---------------------------------------------------------------------------
# Conv 3x3 ('same') + bias + ReLU + 2x2 max-pool, one haloed row-slab per grid step.
# ---------------------------------------------------------------------------
def _conv3x3_relu_pool_kernel(xp_ref, w_ref, b_ref, o_ref, s1, s2):
    """xp_ref: (1, tH+2, W+2, Cin)  zero-padded, haloed NHWC row slab
       w_ref : (3, 3, Cin, Cout)    HWIO weights
       b_ref : (1, Cout)
       o_ref : (1, tH//2, W//2, Cout)
       s1    : VMEM (tH, W, Cout) f32   post-ReLU conv tile
       s2    : VMEM (tH//2, W, Cout) f32 row-pooled tile
    """
    _, tHp, Wp, Cin = xp_ref.shape
    tH, W = tHp - 2, Wp - 2
    Cout = w_ref.shape[-1]

    acc = jnp.zeros((tH, W, Cout), dtype=jnp.float32)
    for kh in range(3):                       # statically unrolled 3x3 taps
        for kw in range(3):
            patch = xp_ref[0, kh:kh + tH, kw:kw + W, :]       # (tH, W, Cin)
            tap_w = w_ref[kh, kw]                             # (Cin, Cout)
            if Cin == 1:
                # Cin==1: K=1 matmul has zero MXU value -> broadcast FMA on the VPU.
                acc = acc + patch * tap_w[0][None, None, :]
            else:
                contrib = jnp.dot(patch.reshape(tH * W, Cin), tap_w,
                                  preferred_element_type=jnp.float32)
                acc = acc + contrib.reshape(tH, W, Cout)
            # TODO(synk): fuse the 9 taps into one (tH*W, 9*Cin)x(9*Cin, Cout) im2col
            # matmul once lane-dim concat of Cin-wide pieces is available.

    acc = acc + jnp.reshape(b_ref[...], (1, 1, Cout))
    s1[...] = jnp.maximum(acc, 0.0)                           # fused ReLU

    tH2, W2 = tH // 2, W // 2
    # fused 2x2 max-pool via strided reads of the VMEM tile (no HBM round trip)
    s2[...] = jnp.maximum(s1[pl.ds(0, tH2, 2)], s1[pl.ds(1, tH2, 2)])
    pooled = jnp.maximum(s2[:, pl.ds(0, W2, 2), :], s2[:, pl.ds(1, W2, 2), :])
    o_ref[0] = pooled.astype(o_ref.dtype)


def conv_relu_pool(x_nhwc, w_hwio, b, tile_h):
    N, H, W, Cin = x_nhwc.shape
    Cout = w_hwio.shape[-1]
    assert H % tile_h == 0 and tile_h % 2 == 0 and W % 2 == 0
    n_tiles = H // tile_h
    tH2, W2 = tile_h // 2, W // 2

    # 'same' padding + halo-row slabs built host-side (halo rows are duplicated so the
    # BlockSpec pipeline stays trivial and auto double-buffered).
    xp = jnp.pad(x_nhwc, ((0, 0), (1, 1), (1, 1), (0, 0)))
    slabs = jnp.stack(
        [xp[:, i * tile_h: i * tile_h + tile_h + 2] for i in range(n_tiles)], axis=1)
    slabs = slabs.reshape(N * n_tiles, tile_h + 2, W + 2, Cin)

    out = pl.pallas_call(
        _conv3x3_relu_pool_kernel,
        out_shape=jax.ShapeDtypeStruct((N * n_tiles, tH2, W2, Cout), x_nhwc.dtype),
        grid=(N * n_tiles,),
        in_specs=[
            pl.BlockSpec((1, tile_h + 2, W + 2, Cin), lambda t: (t, 0, 0, 0)),
            pl.BlockSpec((3, 3, Cin, Cout), lambda t: (0, 0, 0, 0)),
            pl.BlockSpec((1, Cout), lambda t: (0, 0)),
        ],
        out_specs=pl.BlockSpec((1, tH2, W2, Cout), lambda t: (t, 0, 0, 0)),
        scratch_shapes=[
            pltpu.VMEM((tile_h, W, Cout), jnp.float32),
            pltpu.VMEM((tH2, W, Cout), jnp.float32),
        ],
        compiler_params=pltpu.CompilerParams(
            dimension_semantics=("parallel",),          # batch/row tiles are independent
            vmem_limit_bytes=48 * 1024 * 1024),          # fits v7x's 64 MiB VMEM
    )(slabs, w_hwio, b)
    return out.reshape(N, n_tiles * tH2, W2, Cout)


# ---------------------------------------------------------------------------
# Linear: K-tiled reduction grid with an f32 accumulator, lane-dense (padded) out dim.
# ---------------------------------------------------------------------------
def _linear_kernel(x_ref, w_ref, b_ref, o_ref, acc_ref):
    k = pl.program_id(0)

    @pl.when(k == 0)
    def _():
        acc_ref[...] = jnp.zeros_like(acc_ref)

    acc_ref[...] += jnp.dot(x_ref[...], w_ref[...],
                            preferred_element_type=jnp.float32)

    @pl.when(k == pl.num_programs(0) - 1)
    def _():
        o_ref[...] = (acc_ref[...] + b_ref[...]).astype(o_ref.dtype)


def linear(x, w_pad, b_pad, out_dim, tile_k=256):
    N, K = x.shape
    NP = w_pad.shape[1]                     # out dim padded to a multiple of 128
    tk = tile_k if K % tile_k == 0 else K
    nk = K // tk
    out = pl.pallas_call(
        _linear_kernel,
        out_shape=jax.ShapeDtypeStruct((N, NP), x.dtype),
        grid=(nk,),
        in_specs=[
            pl.BlockSpec((N, tk), lambda k: (0, k)),
            pl.BlockSpec((tk, NP), lambda k: (k, 0)),
            pl.BlockSpec((1, NP), lambda k: (0, 0)),
        ],
        out_specs=pl.BlockSpec((N, NP), lambda k: (0, 0)),
        scratch_shapes=[pltpu.VMEM((N, NP), jnp.float32)],
        compiler_params=pltpu.CompilerParams(
            dimension_semantics=("arbitrary",),          # K is a reduction axis
            vmem_limit_bytes=48 * 1024 * 1024),
    )(x, w_pad, b_pad)
    return out[:, :out_dim]


# ---------------------------------------------------------------------------
# Full forward pass.
# ---------------------------------------------------------------------------
def cnn_500_part_forward(x_nchw, params, tile_h1=8, tile_h2=4):
    N = x_nchw.shape[0]
    out_dim = params["b_out"].shape[1]
    x = jnp.transpose(x_nchw, (0, 2, 3, 1))                    # NCHW -> NHWC (N,H,W,1)
    h1 = conv_relu_pool(x, params["w1"], params["b1"], tile_h1)    # (N, H/2, W/2, 16)
    h2 = conv_relu_pool(h1, params["w2"], params["b2"], tile_h2)   # (N, H/4, W/4, 32)
    # NHWC flatten feeds the pre-permuted w_out: no NCHW transpose round trip anymore.
    flat = h2.reshape(N, -1)
    return linear(flat, params["w_out_nhwc"], params["b_out_pad"], out_dim)


def reference_forward(x_nchw, params):
    """Pure-JAX reference with the original torch (NCHW-flatten) Linear layout."""
    x = jnp.transpose(x_nchw, (0, 2, 3, 1))

    def block(x, w, b):
        y = jax.lax.conv_general_dilated(
            x, w, window_strides=(1, 1), padding="SAME",
            dimension_numbers=("NHWC", "HWIO", "NHWC"))
        y = jax.nn.relu(y + b.reshape(1, 1, 1, -1))
        return jax.lax.reduce_window(y, -jnp.inf, jax.lax.max,
                                     (1, 2, 2, 1), (1, 2, 2, 1), "VALID")

    h = block(x, params["w1"], params["b1"])
    h = block(h, params["w2"], params["b2"])
    flat = jnp.transpose(h, (0, 3, 1, 2)).reshape(x.shape[0], -1)   # torch .view order
    return flat @ params["w_out"] + params["b_out"]


def init_params(key, H, W, output_dim):
    # PyTorch shapes: conv1.weight (16,1,3,3), conv2.weight (32,16,3,3),
    # out.weight (output_dim, 32*(H//4)*(W//4)). Stored here as HWIO / (in, out) with
    # the Linear rows in torch NCHW-flatten order.
    ks = jax.random.split(key, 6)
    w1 = jax.random.uniform(ks[0], (3, 3, 1, 16), jnp.float32, -0.3, 0.3)
    b1 = jax.random.uniform(ks[1], (1, 16), jnp.float32, -0.3, 0.3)
    w2 = jax.random.uniform(ks[2], (3, 3, 16, 32), jnp.float32, -0.1, 0.1)
    b2 = jax.random.uniform(ks[3], (1, 32), jnp.float32, -0.1, 0.1)
    in_features = 32 * (H // 4) * (W // 4)
    w_out = jax.random.uniform(ks[4], (in_features, output_dim),
                               jnp.float32, -0.05, 0.05)
    b_out = jax.random.uniform(ks[5], (1, output_dim), jnp.float32, -0.05, 0.05)
    return dict(w1=w1, b1=b1, w2=w2, b2=b2, w_out=w_out, b_out=b_out)


def prepare_params(params, H, W, output_dim):
    """One-time: permute w_out rows from torch NCHW-flatten order (c,h,w) to the
    NHWC-flatten order (h,w,c) produced by the Pallas path, and pad the out dim to a
    lane-dense multiple of 128."""
    H4, W4 = H // 4, W // 4
    w_nhwc = (params["w_out"].reshape(32, H4, W4, output_dim)
              .transpose(1, 2, 0, 3).reshape(H4 * W4 * 32, output_dim))
    np_out = 128 * ((output_dim + 127) // 128)
    p = dict(params)
    p["w_out_nhwc"] = jnp.pad(w_nhwc, ((0, 0), (0, np_out - output_dim)))
    p["b_out_pad"] = jnp.pad(params["b_out"], ((0, 0), (0, np_out - output_dim)))
    return p


if __name__ == "__main__":
    # The real module implies a 500x500 single-channel input (Linear(32*125*125, out));
    # we run a 16x16 demo so the per-layer semantics are identical with
    # in_features = 32*4*4, while still exercising the row-tiled grids (2 tiles/layer)
    # and the K-tiled Linear (2 K steps).
    N, H, W, output_dim = 2, 16, 16, 10
    key = jax.random.PRNGKey(0)
    k_x, k_p = jax.random.split(key)
    x = jax.random.normal(k_x, (N, 1, H, W), jnp.float32)
    params = prepare_params(init_params(k_p, H, W, output_dim), H, W, output_dim)

    out = jax.block_until_ready(cnn_500_part_forward(x, params, tile_h1=8, tile_h2=4))
    ref = jax.block_until_ready(reference_forward(x, params))
    assert out.shape == (N, output_dim)
    np.testing.assert_allclose(np.asarray(out), np.asarray(ref),
                               rtol=1e-4, atol=1e-4)
    print("KERNEL_OK")
</pallas_src>

<mosaic_0001>
module attributes {stable_mosaic.version = 11 : i64} {
  func.func @_conv3x3_relu_pool_kernel(%arg0: i32, %arg1: memref<1x10x18x1xf32, #tpu.memory_space<vmem>>, %arg2: memref<3x3x1x16xf32, #tpu.memory_space<vmem>>, %arg3: memref<1x16xf32, #tpu.memory_space<vmem>>, %arg4: memref<1x4x8x16xf32, #tpu.memory_space<vmem>>, %arg5: memref<8x16x16xf32, #tpu.memory_space<vmem>>, %arg6: memref<4x16x16xf32, #tpu.memory_space<vmem>>) attributes {dimension_semantics = [#tpu.dimension_semantics<parallel>], iteration_bounds = array<i64: 4>, scalar_prefetch = 0 : i64, scratch_operands = 2 : i64, tpu.core_type = #tpu.core_type<tc>, window_params = [{transform_indices = @transform_0, window_bounds = array<i64: 1, 10, 18, 1>}, {pipeline_mode = #tpu.pipeline_mode<synchronous>, transform_indices = @transform_1, window_bounds = array<i64: 3, 3, 1, 16>}, {pipeline_mode = #tpu.pipeline_mode<synchronous>, transform_indices = @transform_2, window_bounds = array<i64: 1, 16>}, {transform_indices = @transform_3, window_bounds = array<i64: 1, 4, 8, 16>}]} {
    %cst = arith.constant 0.000000e+00 : f32
    %0 = vector.broadcast %cst : f32 to vector<8x16x16xf32>
    %c0 = arith.constant 0 : index
    %c0_0 = arith.constant 0 : index
    %c0_1 = arith.constant 0 : index
    %c0_2 = arith.constant 0 : index
    %1 = vector.load %arg1[%c0, %c0_0, %c0_1, %c0_2] : memref<1x10x18x1xf32, #tpu.memory_space<vmem>>, vector<1x8x16x1xf32>
    %2 = vector.shape_cast %1 : vector<1x8x16x1xf32> to vector<8x16x1xf32>
    %c0_3 = arith.constant 0 : index
    %c0_4 = arith.constant 0 : index
    %c0_5 = arith.constant 0 : index
    %c0_6 = arith.constant 0 : index
    %3 = vector.load %arg2[%c0_3, %c0_4, %c0_5, %c0_6] : memref<3x3x1x16xf32, #tpu.memory_space<vmem>>, vector<1x1x1x16xf32>
    %4 = vector.shape_cast %3 : vector<1x1x1x16xf32> to vector<1x16xf32>
    %5 = vector.shape_cast %4 : vector<1x16xf32> to vector<16xf32>
    %6 = vector.shape_cast %5 : vector<16xf32> to vector<1x1x16xf32>
    %7 = vector.broadcast %2 : vector<8x16x1xf32> to vector<8x16x16xf32>
    %8 = vector.broadcast %6 : vector<1x1x16xf32> to vector<8x16x16xf32>
    %9 = arith.mulf %7, %8 : vector<8x16x16xf32>
    %10 = arith.addf %0, %9 : vector<8x16x16xf32>
    %c0_7 = arith.constant 0 : index
    %c0_8 = arith.constant 0 : index
    %c1 = arith.constant 1 : index
    %c0_9 = arith.constant 0 : index
    %11 = vector.load %arg1[%c0_7, %c0_8, %c1, %c0_9] : memref<1x10x18x1xf32, #tpu.memory_space<vmem>>, vector<1x8x16x1xf32>
    %12 = vector.shape_cast %11 : vector<1x8x16x1xf32> to vector<8x16x1xf32>
    %c0_10 = arith.constant 0 : index
    %c1_11 = arith.constant 1 : index
    %c0_12 = arith.constant 0 : index
    %c0_13 = arith.constant 0 : index
    %13 = vector.load %arg2[%c0_10, %c1_11, %c0_12, %c0_13] : memref<3x3x1x16xf32, #tpu.memory_space<vmem>>, vector<1x1x1x16xf32>
    %14 = vector.shape_cast %13 : vector<1x1x1x16xf32> to vector<1x16xf32>
    %15 = vector.shape_cast %14 : vector<1x16xf32> to vector<16xf32>
    %16 = vector.shape_cast %15 : vector<16xf32> to vector<1x1x16xf32>
    %17 = vector.broadcast %12 : vector<8x16x1xf32> to vector<8x16x16xf32>
    %18 = vector.broadcast %16 : vector<1x1x16xf32> to vector<8x16x16xf32>
    %19 = arith.mulf %17, %18 : vector<8x16x16xf32>
    %20 = arith.addf %10, %19 : vector<8x16x16xf32>
    %c0_14 = arith.constant 0 : index
    %c0_15 = arith.constant 0 : index
    %c2 = arith.constant 2 : index
    %c0_16 = arith.constant 0 : index
    %21 = vector.load %arg1[%c0_14, %c0_15, %c2, %c0_16] : memref<1x10x18x1xf32, #tpu.memory_space<vmem>>, vector<1x8x16x1xf32>
    %22 = vector.shape_cast %21 : vector<1x8x16x1xf32> to vector<8x16x1xf32>
    %c0_17 = arith.constant 0 : index
    %c2_18 = arith.constant 2 : index
    %c0_19 = arith.constant 0 : index
    %c0_20 = arith.constant 0 : index
    %23 = vector.load %arg2[%c0_17, %c2_18, %c0_19, %c0_20] : memref<3x3x1x16xf32, #tpu.memory_space<vmem>>, vector<1x1x1x16xf32>
    %24 = vector.shape_cast %23 : vector<1x1x1x16xf32> to vector<1x16xf32>
    %25 = vector.shape_cast %24 : vector<1x16xf32> to vector<16xf32>
    %26 = vector.shape_cast %25 : vector<16xf32> to vector<1x1x16xf32>
    %27 = vector.broadcast %22 : vector<8x16x1xf32> to vector<8x16x16xf32>
    %28 = vector.broadcast %26 : vector<1x1x16xf32> to vector<8x16x16xf32>
    %29 = arith.mulf %27, %28 : vector<8x16x16xf32>
    %30 = arith.addf %20, %29 : vector<8x16x16xf32>
    %c0_21 = arith.constant 0 : index
    %c1_22 = arith.constant 1 : index
    %c0_23 = arith.constant 0 : index
    %c0_24 = arith.constant 0 : index
    %31 = vector.load %arg1[%c0_21, %c1_22, %c0_23, %c0_24] : memref<1x10x18x1xf32, #tpu.memory_space<vmem>>, vector<1x8x16x1xf32>
    %32 = vector.shape_cast %31 : vector<1x8x16x1xf32> to vector<8x16x1xf32>
    %c1_25 = arith.constant 1 : index
    %c0_26 = arith.constant 0 : index
    %c0_27 = arith.constant 0 : index
    %c0_28 = arith.constant 0 : index
    %33 = vector.load %arg2[%c1_25, %c0_26, %c0_27, %c0_28] : memref<3x3x1x16xf32, #tpu.memory_space<vmem>>, vector<1x1x1x16xf32>
    %34 = vector.shape_cast %33 : vector<1x1x1x16xf32> to vector<1x16xf32>
    %35 = vector.shape_cast %34 : vector<1x16xf32> to vector<16xf32>
    %36 = vector.shape_cast %35 : vector<16xf32> to vector<1x1x16xf32>
    %37 = vector.broadcast %32 : vector<8x16x1xf32> to vector<8x16x16xf32>
    %38 = vector.broadcast %36 : vector<1x1x16xf32> to vector<8x16x16xf32>
    %39 = arith.mulf %37, %38 : vector<8x16x16xf32>
    %40 = arith.addf %30, %39 : vector<8x16x16xf32>
    %c0_29 = arith.constant 0 : index
    %c1_30 = arith.constant 1 : index
    %c1_31 = arith.constant 1 : index
    %c0_32 = arith.constant 0 : index
    %41 = vector.load %arg1[%c0_29, %c1_30, %c1_31, %c0_32] : memref<1x10x18x1xf32, #tpu.memory_space<vmem>>, vector<1x8x16x1xf32>
    %42 = vector.shape_cast %41 : vector<1x8x16x1xf32> to vector<8x16x1xf32>
    %c1_33 = arith.constant 1 : index
    %c1_34 = arith.constant 1 : index
    %c0_35 = arith.constant 0 : index
    %c0_36 = arith.constant 0 : index
    %43 = vector.load %arg2[%c1_33, %c1_34, %c0_35, %c0_36] : memref<3x3x1x16xf32, #tpu.memory_space<vmem>>, vector<1x1x1x16xf32>
    %44 = vector.shape_cast %43 : vector<1x1x1x16xf32> to vector<1x16xf32>
    %45 = vector.shape_cast %44 : vector<1x16xf32> to vector<16xf32>
    %46 = vector.shape_cast %45 : vector<16xf32> to vector<1x1x16xf32>
    %47 = vector.broadcast %42 : vector<8x16x1xf32> to vector<8x16x16xf32>
    %48 = vector.broadcast %46 : vector<1x1x16xf32> to vector<8x16x16xf32>
    %49 = arith.mulf %47, %48 : vector<8x16x16xf32>
    %50 = arith.addf %40, %49 : vector<8x16x16xf32>
    %c0_37 = arith.constant 0 : index
    %c1_38 = arith.constant 1 : index
    %c2_39 = arith.constant 2 : index
    %c0_40 = arith.constant 0 : index
    %51 = vector.load %arg1[%c0_37, %c1_38, %c2_39, %c0_40] : memref<1x10x18x1xf32, #tpu.memory_space<vmem>>, vector<1x8x16x1xf32>
    %52 = vector.shape_cast %51 : vector<1x8x16x1xf32> to vector<8x16x1xf32>
    %c1_41 = arith.constant 1 : index
    %c2_42 = arith.constant 2 : index
    %c0_43 = arith.constant 0 : index
    %c0_44 = arith.constant 0 : index
    %53 = vector.load %arg2[%c1_41, %c2_42, %c0_43, %c0_44] : memref<3x3x1x16xf32, #tpu.memory_space<vmem>>, vector<1x1x1x16xf32>
    %54 = vector.shape_cast %53 : vector<1x1x1x16xf32> to vector<1x16xf32>
    %55 = vector.shape_cast %54 : vector<1x16xf32> to vector<16xf32>
    %56 = vector.shape_cast %55 : vector<16xf32> to vector<1x1x16xf32>
    %57 = vector.broadcast %52 : vector<8x16x1xf32> to vector<8x16x16xf32>
    %58 = vector.broadcast %56 : vector<1x1x16xf32> to vector<8x16x16xf32>
    %59 = arith.mulf %57, %58 : vector<8x16x16xf32>
    %60 = arith.addf %50, %59 : vector<8x16x16xf32>
    %c0_45 = arith.constant 0 : index
    %c2_46 = arith.constant 2 : index
    %c0_47 = arith.constant 0 : index
    %c0_48 = arith.constant 0 : index
    %61 = vector.load %arg1[%c0_45, %c2_46, %c0_47, %c0_48] : memref<1x10x18x1xf32, #tpu.memory_space<vmem>>, vector<1x8x16x1xf32>
    %62 = vector.shape_cast %61 : vector<1x8x16x1xf32> to vector<8x16x1xf32>
    %c2_49 = arith.constant 2 : index
    %c0_50 = arith.constant 0 : index
    %c0_51 = arith.constant 0 : index
    %c0_52 = arith.constant 0 : index
    %63 = vector.load %arg2[%c2_49, %c0_50, %c0_51, %c0_52] : memref<3x3x1x16xf32, #tpu.memory_space<vmem>>, vector<1x1x1x16xf32>
    %64 = vector.shape_cast %63 : vector<1x1x1x16xf32> to vector<1x16xf32>
    %65 = vector.shape_cast %64 : vector<1x16xf32> to vector<16xf32>
    %66 = vector.shape_cast %65 : vector<16xf32> to vector<1x1x16xf32>
    %67 = vector.broadcast %62 : vector<8x16x1xf32> to vector<8x16x16xf32>
    %68 = vector.broadcast %66 : vector<1x1x16xf32> to vector<8x16x16xf32>
    %69 = arith.mulf %67, %68 : vector<8x16x16xf32>
    %70 = arith.addf %60, %69 : vector<8x16x16xf32>
    %c0_53 = arith.constant 0 : index
    %c2_54 = arith.constant 2 : index
    %c1_55 = arith.constant 1 : index
    %c0_56 = arith.constant 0 : index
    %71 = vector.load %arg1[%c0_53, %c2_54, %c1_55, %c0_56] : memref<1x10x18x1xf32, #tpu.memory_space<vmem>>, vector<1x8x16x1xf32>
    %72 = vector.shape_cast %71 : vector<1x8x16x1xf32> to vector<8x16x1xf32>
    %c2_57 = arith.constant 2 : index
    %c1_58 = arith.constant 1 : index
    %c0_59 = arith.constant 0 : index
    %c0_60 = arith.constant 0 : index
    %73 = vector.load %arg2[%c2_57, %c1_58, %c0_59, %c0_60] : memref<3x3x1x16xf32, #tpu.memory_space<vmem>>, vector<1x1x1x16xf32>
    %74 = vector.shape_cast %73 : vector<1x1x1x16xf32> to vector<1x16xf32>
    %75 = vector.shape_cast %74 : vector<1x16xf32> to vector<16xf32>
    %76 = vector.shape_cast %75 : vector<16xf32> to vector<1x1x16xf32>
    %77 = vector.broadcast %72 : vector<8x16x1xf32> to vector<8x16x16xf32>
    %78 = vector.broadcast %76 : vector<1x1x16xf32> to vector<8x16x16xf32>
    %79 = arith.mulf %77, %78 : vector<8x16x16xf32>
    %80 = arith.addf %70, %79 : vector<8x16x16xf32>
    %c0_61 = arith.constant 0 : index
    %c2_62 = arith.constant 2 : index
    %c2_63 = arith.constant 2 : index
    %c0_64 = arith.constant 0 : index
    %81 = vector.load %arg1[%c0_61, %c2_62, %c2_63, %c0_64] : memref<1x10x18x1xf32, #tpu.memory_space<vmem>>, vector<1x8x16x1xf32>
    %82 = vector.shape_cast %81 : vector<1x8x16x1xf32> to vector<8x16x1xf32>
    %c2_65 = arith.constant 2 : index
    %c2_66 = arith.constant 2 : index
    %c0_67 = arith.constant 0 : index
    %c0_68 = arith.constant 0 : index
    %83 = vector.load %arg2[%c2_65, %c2_66, %c0_67, %c0_68] : memref<3x3x1x16xf32, #tpu.memory_space<vmem>>, vector<1x1x1x16xf32>
    %84 = vector.shape_cast %83 : vector<1x1x1x16xf32> to vector<1x16xf32>
    %85 = vector.shape_cast %84 : vector<1x16xf32> to vector<16xf32>
    %86 = vector.shape_cast %85 : vector<16xf32> to vector<1x1x16xf32>
    %87 = vector.broadcast %82 : vector<8x16x1xf32> to vector<8x16x16xf32>
    %88 = vector.broadcast %86 : vector<1x1x16xf32> to vector<8x16x16xf32>
    %89 = arith.mulf %87, %88 : vector<8x16x16xf32>
    %90 = arith.addf %80, %89 : vector<8x16x16xf32>
    %c0_69 = arith.constant 0 : index
    %c0_70 = arith.constant 0 : index
    %91 = vector.load %arg3[%c0_69, %c0_70] : memref<1x16xf32, #tpu.memory_space<vmem>>, vector<1x16xf32>
    %92 = vector.shape_cast %91 : vector<1x16xf32> to vector<1x1x16xf32>
    %93 = vector.broadcast %92 : vector<1x1x16xf32> to vector<8x16x16xf32>
    %94 = arith.addf %90, %93 : vector<8x16x16xf32>
    %cst_71 = arith.constant 0.000000e+00 : f32
    %95 = vector.broadcast %cst_71 : f32 to vector<8x16x16xf32>
    %96 = arith.maximumf %94, %95 : vector<8x16x16xf32>
    %c0_72 = arith.constant 0 : index
    %c0_73 = arith.constant 0 : index
    %c0_74 = arith.constant 0 : index
    %97 = vector.load %arg5[%c0_72, %c0_73, %c0_74] : memref<8x16x16xf32, #tpu.memory_space<vmem>>, vector<8x16x16xf32>
    tpu.vector_store %arg5[%c0_72, %c0_73, %c0_74], %96 {strides = array<i32>} : memref<8x16x16xf32, #tpu.memory_space<vmem>>, vector<8x16x16xf32>,
    %c0_75 = arith.constant 0 : index
    %c0_76 = arith.constant 0 : index
    %c0_77 = arith.constant 0 : index
    %98 = tpu.strided_load %arg5[%c0_75, %c0_76, %c0_77] {strides = array<i32: 2, 1, 1>} : memref<8x16x16xf32, #tpu.memory_space<vmem>>, vector<4x16x16xf32>
    %c1_78 = arith.constant 1 : index
    %c0_79 = arith.constant 0 : index
    %c0_80 = arith.constant 0 : index
    %99 = tpu.strided_load %arg5[%c1_78, %c0_79, %c0_80] {strides = array<i32: 2, 1, 1>} : memref<8x16x16xf32, #tpu.memory_space<vmem>>, vector<4x16x16xf32>
    %100 = arith.maximumf %98, %99 : vector<4x16x16xf32>
    %c0_81 = arith.constant 0 : index
    %c0_82 = arith.constant 0 : index
    %c0_83 = arith.constant 0 : index
    %101 = vector.load %arg6[%c0_81, %c0_82, %c0_83] : memref<4x16x16xf32, #tpu.memory_space<vmem>>, vector<4x16x16xf32>
    tpu.vector_store %arg6[%c0_81, %c0_82, %c0_83], %100 {strides = array<i32>} : memref<4x16x16xf32, #tpu.memory_space<vmem>>, vector<4x16x16xf32>,
    %c0_84 = arith.constant 0 : index
    %c0_85 = arith.constant 0 : index
    %c0_86 = arith.constant 0 : index
    %102 = tpu.strided_load %arg6[%c0_84, %c0_85, %c0_86] {strides = array<i32: 1, 2, 1>} : memref<4x16x16xf32, #tpu.memory_space<vmem>>, vector<4x8x16xf32>
    %c0_87 = arith.constant 0 : index
    %c1_88 = arith.constant 1 : index
    %c0_89 = arith.constant 0 : index
    %103 = tpu.strided_load %arg6[%c0_87, %c1_88, %c0_89] {strides = array<i32: 1, 2, 1>} : memref<4x16x16xf32, #tpu.memory_space<vmem>>, vector<4x8x16xf32>
    %104 = arith.maximumf %102, %103 : vector<4x8x16xf32>
    %c0_90 = arith.constant 0 : index
    %c0_91 = arith.constant 0 : index
    %c0_92 = arith.constant 0 : index
    %c0_93 = arith.constant 0 : index
    %105 = vector.load %arg4[%c0_90, %c0_91, %c0_92, %c0_93] : memref<1x4x8x16xf32, #tpu.memory_space<vmem>>, vector<1x4x8x16xf32>
    %106 = vector.shape_cast %105 : vector<1x4x8x16xf32> to vector<4x8x16xf32>
    %107 = vector.shape_cast %104 : vector<4x8x16xf32> to vector<1x4x8x16xf32>
    tpu.vector_store %arg4[%c0_90, %c0_91, %c0_92, %c0_93], %107 {strides = array<i32>} : memref<1x4x8x16xf32, #tpu.memory_space<vmem>>, vector<1x4x8x16xf32>,
    return
  }
  func.func @transform_0(%arg0: i32) -> (i32, i32, i32, i32) {
    %c0_i32 = arith.constant 0 : i32
    %c0_i32_0 = arith.constant 0 : i32
    %c0_i32_1 = arith.constant 0 : i32
    %c0_i32_2 = arith.constant 0 : i32
    return %arg0, %c0_i32, %c0_i32_0, %c0_i32_1 : i32, i32, i32, i32
  }
  func.func @transform_1(%arg0: i32) -> (i32, i32, i32, i32) {
    %c0_i32 = arith.constant 0 : i32
    %c0_i32_0 = arith.constant 0 : i32
    %c0_i32_1 = arith.constant 0 : i32
    %c0_i32_2 = arith.constant 0 : i32
    %c0_i32_3 = arith.constant 0 : i32
    return %c0_i32, %c0_i32_0, %c0_i32_1, %c0_i32_2 : i32, i32, i32, i32
  }
  func.func @transform_2(%arg0: i32) -> (i32, i32) {
    %c0_i32 = arith.constant 0 : i32
    %c0_i32_0 = arith.constant 0 : i32
    %c0_i32_1 = arith.constant 0 : i32
    return %c0_i32, %c0_i32_0 : i32, i32
  }
  func.func @transform_3(%arg0: i32) -> (i32, i32, i32, i32) {
    %c0_i32 = arith.constant 0 : i32
    %c0_i32_0 = arith.constant 0 : i32
    %c0_i32_1 = arith.constant 0 : i32
    %c0_i32_2 = arith.constant 0 : i32
    return %arg0, %c0_i32, %c0_i32_0, %c0_i32_1 : i32, i32, i32, i32
  }
}

</mosaic_0001>

<bundles_post_ra>
// kernel: tpu_custom_call.1
= control target key start
LH: loop header
LB: loop body
LE: loop exit
PB: predicated region body
PF: predicated region fallthrough
CT: control target
= control target key end

     0   :  { %8 = vsyncpa [#allocation5], 0  ;;  %s2807_s0 = inlined_call_operand.vmem [shape: f32[4,10,18,1], index: 0, kind: input, shape index: {}]   ;;  %s2808_s1 = inlined_call_operand.vmem [shape: f32[3,3,1,16], index: 1, kind: input, shape index: {}]   ;;  %s2809_s2 = inlined_call_operand.vmem [shape: f32[1,16], index: 2, kind: input, shape index: {}]   ;;  %s2810_s3 = inlined_call_operand.hbm [shape: f32[4,4,8,16], index: 3, kind: output, shape index: {}]  }
   0x1   :  { %10 = vsyncpa [#allocation5 + $0x1], 0  ;;  %s1841_s12 = smov 0   ;;  %s1843_s13 = smov 0  }
   0x2   :  { %s1845_s14 = smov 0   ;;  %s1847_s15 = smov 0  }
   0x3 LB: > { %s1862_s16 = sadd.s32 4294967295, %s1815_s15   ;;  %s1582_s17 = sadd.s32 4294967294, %s1815_s15   ;;  %s1815_s15 = sphi %s1847_s15, %s2889_s15   ;;  %s1811_s14 = sphi %s1845_s14, %s2888_s14   ;;  %s1807_s13 = sphi %s1843_s13, %s2887_s13   ;;  %s1803_s12 = sphi %s1841_s12, %s2886_s12  }
   0x4   : > { %s1866_s18 = sadd.s32 1, %s1815_s15   ;;  %s91_s19 = sadd.s32 1, %s1811_s14 }
   0x5   : > { %s88_s20 = ssub.s32 %s1815_s15, %s1866_s18  ;;  %p101_p0 = scmp.ne.s32.totalorder %s1811_s14, %s1807_s13 }
   0x6   : > { %p89_p1 = scmp.eq.s32.totalorder %s88_s20, 0  ;;  %p102_p2 = scmp.eq.s32.totalorder %s1862_s16, 3 }
   0x7   : > { %p107_p3 = scmp.ne.s32.totalorder %s1807_s13, %s1803_s12  ;;  %p108_p4 = scmp.eq.s32.totalorder %s1582_s17, 3 }
   0x8   : > { %s1877_s21 = scalar_select %p89_p1, %s1811_s14, %s91_s19  }
   0x9   : > { %p1879_p5 = por %p102_p2, %p101_p0  ;;  %p1883_p6 = por %p108_p4, %p107_p3 }
   0xa   : > { %p1585_p7 = scmp.ge.s32.totalorder %s1815_s15, 1  ;;  %p140_p8 = scmp.lt.s32.totalorder %s1815_s15, 5 }
   0xc   : > { %p141_p9 = pnand %p1585_p7, %p140_p8 }
   0xe   : > { %144 = sbr.rel (%p141_p9) target bundleno = 485 (0x1e5), region = 32 }
  0x15   : > { %p164_p10 = scmp.lt.s32.totalorder %s1862_s16, 3  ;;  %v1817_v0 = vmov 0   ;;  %vm1433_vm0 = vcmask 130048   ;;  %s161_s4 = sand.u32 1, %s1807_s13  }
  0x16   : > { %1752 = vset.pattern.permute.xlu1 %v1817_v0  ;;  %1751 = vset.pattern.permute.xlu0 %v1817_v0  ;;  %s2722_s5 = sshll.u32 %s161_s4, 5  ;;  %s1707_s7 = sshll.u32 %s1862_s16, 9 }
  0x17   : > { %s165_s24 = scalar_select %p164_p10, %s1862_s16, 3 }
  0x18   : > { %s2737_s6 = scalar_lea.vmem [#allocation4], %s2722_s5  ;;  %s2758_s11 = scalar_lea.hbm %s2810_s3, %s1707_s7 }
  0x19   : > { %s1708_s25 = smul.u32 240, %s165_s24  ;;  %s1520_s8 = sshll.u32 %s2737_s6, 4  ;;  %s2760_s8 = int_to_ptr.vmem [resolvable:$true] %s1520_s8 }
  0x1a   : > { %s2766_s17 = scalar_lea.sflag [#allocation5], %s161_s4  ;;  %s1753_s16 = scalar_lea.vmem %s2760_s8, 512 }
  0x1b   : > { %s1894_s28 = scalar_lea.vmem %s2807_s0, %s1708_s25  ;;  %p1754_p11 = scmp.ne.s32.totalorder %s2760_s8, %s1753_s16 }
  0x1c   : > { %v1897_v1 = vld [vmem:[%s1894_s28 + $0x18] sm:$0xff]  ;;  %v169_v2 = vld [vmem:[%s1894_s28] sm:$0xff]  ;;  %v170_v4 = vld [vmem:[%s1894_s28 + $0x8] sm:$0xff]  ;;  %s1818_s19 = smov [#allocation4]  }
  0x1d   : > { %198 = vperm.xlu1 %1752, %v1897_v1   ;;  %188 = vperm.xlu0 %1751, %v169_v2   ;;  %v1902_v3 = vld [vmem:[%s1894_s28 + $0x20] sm:$0xff]  ;;  %v1907_v5 = vld [vmem:[%s1894_s28 + $0x38] sm:$0xff]  ;;  %v1910_v6 = vld [vmem:[%s1894_s28 + $0x30] sm:$0xff]  ;;  %p1755_p12 = pnand %p1754_p11, %p1879_p5  ;;  %s1757_s20 = sshll.u32 %s1818_s19, 4  ;;  %s1758_s20 = int_to_ptr.vmem [resolvable:$false] %s1757_s20 }
  0x1e   : > { %v1915_v7 = vld [vmem:[%s1894_s28 + $0x50] sm:$0xff]  ;;  %v1918_v8 = vld [vmem:[%s1894_s28 + $0x48] sm:$0xff]  ;;  %v1926_v10 = vld [vmem:[%s1894_s28 + $0x60] sm:$0xff]  ;;  %s1759_s24 = scalar_lea.vmem %s1758_s20, 1024  ;;  %p1760_p0 = scmp.lt.s32.totalorder %s2760_s8, %s1758_s20 }
  0x1f   : > { %v1923_v9 = vld [vmem:[%s1894_s28 + $0x68] sm:$0xff]  ;;  %v1931_v11 = vld [vmem:[%s1894_s28 + $0x80] sm:$0xff]  ;;  %v1934_v12 = vld [vmem:[%s1894_s28 + $0x78] sm:$0xff]  ;;  %p1756_p13 = pneg %p1755_p12  ;;  %p1761_p1 = scmp.lt.s32.totalorder %s1759_s24, %s1753_s16 }
  0x20   : > { %v1939_v13 = vld [vmem:[%s1894_s28 + $0x98] sm:$0xff]  ;;  %v1942_v14 = vld [vmem:[%s1894_s28 + $0x90] sm:$0xff]  ;;  %v1950_v16 = vld [vmem:[%s1894_s28 + $0xa8] sm:$0xff] }
  0x21   : > { %203 = vperm.xlu1 %1752, %v1902_v3   ;;  %193 = vperm.xlu0 %1751, %v170_v4   ;;  %v1947_v15 = vld [vmem:[%s1894_s28 + $0xb0] sm:$0xff]  ;;  %v304_v18 = vld [vmem:[%s1894_s28 + $0x1] sm:$0xff]  ;;  %v1960_v20 = vld [vmem:[%s1894_s28 + $0x19] sm:$0xff]  ;;  %p1762_p2 = por %p1761_p1, %p1760_p0 }
  0x22   : > { %v305_v17 = vld [vmem:[%s1894_s28 + $0x9] sm:$0xff]  ;;  %v1957_v19 = vld [vmem:[%s1894_s28 + $0x21] sm:$0xff]  ;;  %v1965_v21 = vld [vmem:[%s1894_s28 + $0x39] sm:$0xff] }
  0x23   : > { %v1968_v22 = vld [vmem:[%s1894_s28 + $0x31] sm:$0xff]  ;;  %v1976_v24 = vld [vmem:[%s1894_s28 + $0x49] sm:$0xff]  ;;  %v1984_v26 = vld [vmem:[%s1894_s28 + $0x61] sm:$0xff]  ;;  %p1763_p3 = pnand %p1762_p2, %p1756_p13 }
  0x24   : > { %v1973_v23 = vld [vmem:[%s1894_s28 + $0x51] sm:$0xff]  ;;  %v1981_v25 = vld [vmem:[%s1894_s28 + $0x69] sm:$0xff]  ;;  %v1989_v27 = vld [vmem:[%s1894_s28 + $0x81] sm:$0xff] }
  0x25   : > { %213 = vperm.xlu1 %1752, %v1907_v5   ;;  %208 = vperm.xlu0 %1751, %v1910_v6   ;;  %v1992_v28 = vld [vmem:[%s1894_s28 + $0x79] sm:$0xff]  ;;  %v2000_v30 = vld [vmem:[%s1894_s28 + $0x91] sm:$0xff]  ;;  %v2008_v32 = vld [vmem:[%s1894_s28 + $0xa9] sm:$0xff] }
  0x26   : > { %v1997_v29 = vld [vmem:[%s1894_s28 + $0x99] sm:$0xff]  ;;  %v2005_v31 = vld [vmem:[%s1894_s28 + $0xb1] sm:$0xff]  ;;  %v440_v34 = vld [vmem:[%s1894_s28 + $0x2] sm:$0xff] }
  0x27   : > { %v441_v33 = vld [vmem:[%s1894_s28 + $0xa] sm:$0xff]  ;;  %v2015_v35 = vld [vmem:[%s1894_s28 + $0x22] sm:$0xff]  ;;  %v2018_v36 = vld [vmem:[%s1894_s28 + $0x1a] sm:$0xff] }
  0x28   : > { %v2023_v37 = vld [vmem:[%s1894_s28 + $0x3a] sm:$0xff]  ;;  %v2026_v38 = vld [vmem:[%s1894_s28 + $0x32] sm:$0xff]  ;;  %v2034_v40 = vld [vmem:[%s1894_s28 + $0x4a] sm:$0xff] }
  0x29   : > { %223 = vperm.xlu1 %1752, %v1915_v7   ;;  %218 = vperm.xlu0 %1751, %v1918_v8   ;;  %2828 = vst [vmem:[#allocation7_spill] sm:$0xff] %v2023_v37  ;;  %2829 = vst [vmem:[#allocation8_spill] sm:$0xff] %v2026_v38  ;;  %v2031_v39 = vld [vmem:[%s1894_s28 + $0x52] sm:$0xff]  ;;  %v2039_v41 = vld [vmem:[%s1894_s28 + $0x6a] sm:$0xff] }
  0x2a   : > { %2830 = vst [vmem:[#allocation9_spill] sm:$0xff] %v2031_v39  ;;  %2831 = vst [vmem:[#allocation10_spill] sm:$0xff] %v2034_v40  ;;  %v2042_v42 = vld [vmem:[%s1894_s28 + $0x62] sm:$0xff]  ;;  %v2050_v44 = vld [vmem:[%s1894_s28 + $0x7a] sm:$0xff] }
  0x2b   : > { %2832 = vst [vmem:[#allocation11_spill] sm:$0xff] %v2039_v41  ;;  %2833 = vst [vmem:[#allocation12_spill] sm:$0xff] %v2042_v42  ;;  %v2047_v43 = vld [vmem:[%s1894_s28 + $0x82] sm:$0xff]  ;;  %v2055_v45 = vld [vmem:[%s1894_s28 + $0x9a] sm:$0xff] }
  0x2c   : > { %2834 = vst [vmem:[#allocation13_spill] sm:$0xff] %v2047_v43  ;;  %2835 = vst [vmem:[#allocation14_spill] sm:$0xff] %v2050_v44  ;;  %v2058_v46 = vld [vmem:[%s1894_s28 + $0x92] sm:$0xff]  ;;  %v2066_v48 = vld [vmem:[%s1894_s28 + $0xaa] sm:$0xff] }
  0x2d   : > { %233 = vperm.xlu1 %1752, %v1923_v9   ;;  %228 = vperm.xlu0 %1751, %v1926_v10   ;;  %2836 = vst [vmem:[#allocation15_spill] sm:$0xff] %v2055_v45  ;;  %2837 = vst [vmem:[#allocation16_spill] sm:$0xff] %v2058_v46  ;;  %v2063_v47 = vld [vmem:[%s1894_s28 + $0xb2] sm:$0xff]  ;;  %v2085_v49 = vld [vmem:[%s1894_s28 + $0xc8] sm:$0xff] }
  0x2e   : > { %2838 = vst [vmem:[#allocation17_spill] sm:$0xff] %v2063_v47  ;;  %2839 = vst [vmem:[#allocation18_spill] sm:$0xff] %v2066_v48  ;;  %v2088_v50 = vld [vmem:[%s1894_s28 + $0xc0] sm:$0xff] }
  0x2f   : > { %v2138_v2 = vld [vmem:[%s1894_s28 + $0xc1] sm:$0xff] }
  0x31   : > { %243 = vperm.xlu1 %1752, %v1931_v11   ;;  %238 = vperm.xlu0 %1751, %v1934_v12  }
  0x35   : > { %253 = vperm.xlu1 %1752, %v1939_v13   ;;  %248 = vperm.xlu0 %1751, %v1942_v14  }
  0x39   : > { %263 = vperm.xlu1 %1752, %v1947_v15   ;;  %258 = vperm.xlu0 %1751, %v1950_v16  }
  0x3d   : > { %329 = vperm.xlu1 %1752, %v305_v17   ;;  %324 = vperm.xlu0 %1751, %v304_v18  }
  0x41   : > { %339 = vperm.xlu1 %1752, %v1957_v19   ;;  %334 = vperm.xlu0 %1751, %v1960_v20  }
  0x45   : > { %349 = vperm.xlu1 %1752, %v1965_v21   ;;  %344 = vperm.xlu0 %1751, %v1968_v22  }
  0x49   : > { %359 = vperm.xlu1 %1752, %v1973_v23   ;;  %354 = vperm.xlu0 %1751, %v1976_v24  }
  0x4d   : > { %369 = vperm.xlu1 %1752, %v1981_v25   ;;  %364 = vperm.xlu0 %1751, %v1984_v26  }
  0x51   : > { %379 = vperm.xlu1 %1752, %v1989_v27   ;;  %374 = vperm.xlu0 %1751, %v1992_v28  }
  0x55   : > { %389 = vperm.xlu1 %1752, %v1997_v29   ;;  %384 = vperm.xlu0 %1751, %v2000_v30  }
  0x59   : > { %399 = vperm.xlu1 %1752, %v2005_v31   ;;  %394 = vperm.xlu0 %1751, %v2008_v32  }
  0x5d   : > { %465 = vperm.xlu1 %1752, %v441_v33   ;;  %460 = vperm.xlu0 %1751, %v440_v34  }
  0x61   : > { %475 = vperm.xlu1 %1752, %v2015_v35   ;;  %470 = vperm.xlu0 %1751, %v2018_v36  }
  0x65   : > { %485 = vperm.xlu1 %1752, %v2023_v37   ;;  %480 = vperm.xlu0 %1751, %v2026_v38  }
  0x69   : > { %495 = vperm.xlu1 %1752, %v2031_v39   ;;  %490 = vperm.xlu0 %1751, %v2034_v40  }
  0x6d   : > { %505 = vperm.xlu1 %1752, %v2039_v41   ;;  %500 = vperm.xlu0 %1751, %v2042_v42  }
  0x71   : > { %515 = vperm.xlu1 %1752, %v2047_v43   ;;  %510 = vperm.xlu0 %1751, %v2050_v44  }
  0x75   : > { %525 = vperm.xlu1 %1752, %v2055_v45   ;;  %520 = vperm.xlu0 %1751, %v2058_v46  }
  0x79   : > { %535 = vperm.xlu1 %1752, %v2063_v47   ;;  %530 = vperm.xlu0 %1751, %v2066_v48  }
  0x7d   : > { %602 = vperm.xlu1 %1752, %v1902_v3   ;;  %597 = vperm.xlu0 %1751, %v1897_v1   ;;  %v2135_v1 = vld [vmem:[%s1894_s28 + $0xc9] sm:$0xff] }
  0x81   : > { %612 = vperm.xlu1 %1752, %v1907_v5   ;;  %607 = vperm.xlu0 %1751, %v1910_v6  }
  0x85   : > { %622 = vperm.xlu1 %1752, %v1915_v7   ;;  %617 = vperm.xlu0 %1751, %v1918_v8  }
  0x89   : > { %632 = vperm.xlu1 %1752, %v1923_v9   ;;  %627 = vperm.xlu0 %1751, %v1926_v10  }
  0x8d   : > { %642 = vperm.xlu1 %1752, %v1931_v11   ;;  %637 = vperm.xlu0 %1751, %v1934_v12  }
  0x91   : > { %652 = vperm.xlu1 %1752, %v1939_v13   ;;  %647 = vperm.xlu0 %1751, %v1942_v14  }
  0x95   : > { %662 = vperm.xlu1 %1752, %v1947_v15   ;;  %657 = vperm.xlu0 %1751, %v1950_v16  }
  0x99   : > { %672 = vperm.xlu1 %1752, %v2085_v49   ;;  %667 = vperm.xlu0 %1751, %v2088_v50  }
  0x9c   : > { %v2092_v51 = vpop.permute.xlu1 %198  ;;  %v2094_v52 = vpop.permute.xlu0 %188 }
  0x9d   : > { %738 = vperm.xlu1 %1752, %v1957_v19   ;;  %733 = vperm.xlu0 %1751, %v1960_v20  }
  0xa0   : > { %v2098_v53 = vpop.permute.xlu1 %203  ;;  %v2100_v54 = vpop.permute.xlu0 %193 }
  0xa1   : > { %748 = vperm.xlu1 %1752, %v1965_v21   ;;  %743 = vperm.xlu0 %1751, %v1968_v22  }
  0xa4   : > { %v2104_v55 = vpop.permute.xlu1 %213  ;;  %v2106_v56 = vpop.permute.xlu0 %208 }
  0xa5   : > { %758 = vperm.xlu1 %1752, %v1973_v23   ;;  %753 = vperm.xlu0 %1751, %v1976_v24  }
  0xa8   : > { %v2110_v57 = vpop.permute.xlu1 %223  ;;  %v2112_v58 = vpop.permute.xlu0 %218 }
  0xa9   : > { %768 = vperm.xlu1 %1752, %v1981_v25   ;;  %763 = vperm.xlu0 %1751, %v1984_v26  }
  0xac   : > { %v2116_v59 = vpop.permute.xlu1 %233  ;;  %v2118_v60 = vpop.permute.xlu0 %228 }
  0xad   : > { %778 = vperm.xlu1 %1752, %v1989_v27   ;;  %773 = vperm.xlu0 %1751, %v1992_v28  }
  0xb0   : > { %v2122_v61 = vpop.permute.xlu1 %243  ;;  %v2124_v62 = vpop.permute.xlu0 %238 }
  0xb1   : > { %788 = vperm.xlu1 %1752, %v1997_v29   ;;  %783 = vperm.xlu0 %1751, %v2000_v30  }
  0xb4   : > { %v2128_v63 = vpop.permute.xlu1 %253  ;;  %v2130_v0 = vpop.permute.xlu0 %248 }
  0xb5   : > { %2840 = vst [vmem:[#allocation19_spill] sm:$0xff] %v2130_v0  ;;  %798 = vperm.xlu1 %1752, %v2005_v31   ;;  %793 = vperm.xlu0 %1751, %v2008_v32  }
  0xb8   : > { %v2140_v3 = vpop.permute.xlu1 %263  ;;  %v2142_v4 = vpop.permute.xlu0 %258 }
  0xb9   : > { %808 = vperm.xlu1 %1752, %v2135_v1   ;;  %803 = vperm.xlu0 %1751, %v2138_v2  }
  0xbc   : > { %v2146_v17 = vpop.permute.xlu1 %329  ;;  %v2148_v18 = vpop.permute.xlu0 %324 }
  0xbd   : > { %874 = vperm.xlu1 %1752, %v2015_v35   ;;  %869 = vperm.xlu0 %1751, %v2018_v36  }
  0xc0   : > { %v2152_v19 = vpop.permute.xlu1 %339  ;;  %v2154_v20 = vpop.permute.xlu0 %334 }
  0xc1   : > { %884 = vperm.xlu1 %1752, %v2023_v37   ;;  %879 = vperm.xlu0 %1751, %v2026_v38  }
  0xc4   : > { %v2158_v33 = vpop.permute.xlu1 %349  ;;  %v2160_v34 = vpop.permute.xlu0 %344 }
  0xc5   : > { %894 = vperm.xlu1 %1752, %v2031_v39   ;;  %889 = vperm.xlu0 %1751, %v2034_v40  }
  0xc8   : > { %v2164_v0 = vpop.permute.xlu1 %359  ;;  %v2166_v35 = vpop.permute.xlu0 %354 }
  0xc9   : > { %904 = vperm.xlu1 %1752, %v2039_v41   ;;  %899 = vperm.xlu0 %1751, %v2042_v42   ;;  %v2189_v42 = vld [vmem:[%s1894_s28 + $0xca] sm:$0xff] }
  0xca   : > { %2844 = vst [vmem:[#allocation23_spill] sm:$0xff] %v2189_v42 }
  0xcc   : > { %v2170_v36 = vpop.permute.xlu1 %369  ;;  %v2172_v38 = vpop.permute.xlu0 %364 }
  0xcd   : > { %914 = vperm.xlu1 %1752, %v2047_v43   ;;  %909 = vperm.xlu0 %1751, %v2050_v44   ;;  %v2192_v43 = vld [vmem:[%s1894_s28 + $0xc2] sm:$0xff] }
  0xce   : > { %2845 = vst [vmem:[#allocation24_spill] sm:$0xff] %v2192_v43 }
  0xd0   : > { %v2176_v39 = vpop.permute.xlu1 %379  ;;  %v2178_v40 = vpop.permute.xlu0 %374 }
  0xd1   : > { %2841 = vst [vmem:[#allocation20_spill] sm:$0xff] %v2176_v39  ;;  %924 = vperm.xlu1 %1752, %v2055_v45   ;;  %919 = vperm.xlu0 %1751, %v2058_v46  }
  0xd4   : > { %v2182_v37 = vpop.permute.xlu1 %389  ;;  %v2184_v41 = vpop.permute.xlu0 %384 }
  0xd5   : > { %2842 = vst [vmem:[#allocation21_spill] sm:$0xff] %v2182_v37  ;;  %2843 = vst [vmem:[#allocation22_spill] sm:$0xff] %v2184_v41  ;;  %934 = vperm.xlu1 %1752, %v2063_v47   ;;  %929 = vperm.xlu0 %1751, %v2066_v48  }
  0xd8   : > { %v2194_v44 = vpop.permute.xlu1 %399  ;;  %v2196_v39 = vpop.permute.xlu0 %394 }
  0xd9   : > { %944 = vperm.xlu1 %1752, %v2189_v42   ;;  %939 = vperm.xlu0 %1751, %v2192_v43  }
  0xdc   : > { %v2200_v46 = vpop.permute.xlu1 %465  ;;  %v2202_v45 = vpop.permute.xlu0 %460 }
  0xdd   : > { %1011 = vperm.xlu1 %1752, %v1907_v5   ;;  %1006 = vperm.xlu0 %1751, %v1910_v6  }
  0xe0   : > { %v2206_v48 = vpop.permute.xlu1 %475  ;;  %v2208_v47 = vpop.permute.xlu0 %470 }
  0xe1   : > { %1021 = vperm.xlu1 %1752, %v1915_v7   ;;  %1016 = vperm.xlu0 %1751, %v1918_v8  }
  0xe4   : > { %v2212_v41 = vpop.permute.xlu1 %485  ;;  %v2214_v42 = vpop.permute.xlu0 %480 }
  0xe5   : > { %1031 = vperm.xlu1 %1752, %v1923_v9   ;;  %1026 = vperm.xlu0 %1751, %v1926_v10  }
  0xe8   : > { %v2218_v43 = vpop.permute.xlu1 %495  ;;  %v2220_v5 = vpop.permute.xlu0 %490 }
  0xe9   : > { %1041 = vperm.xlu1 %1752, %v1931_v11   ;;  %1036 = vperm.xlu0 %1751, %v1934_v12   ;;  %v1662_v12 = vld [vmem:[%s1894_s28 + $0xe0] sm:$0xff] }
  0xec   : > { %v2224_v6 = vpop.permute.xlu1 %505  ;;  %v2226_v7 = vpop.permute.xlu0 %500 }
  0xed   : > { %1051 = vperm.xlu1 %1752, %v1939_v13   ;;  %1046 = vperm.xlu0 %1751, %v1942_v14   ;;  %v1661_v13 = vld [vmem:[%s1894_s28 + $0xd8] sm:$0xff] }
  0xf0   : > { %v2230_v8 = vpop.permute.xlu1 %515  ;;  %v2232_v9 = vpop.permute.xlu0 %510 }
  0xf1   : > { %2846 = vst [vmem:[#allocation25_spill] sm:$0xff] %v2230_v8  ;;  %2847 = vst [vmem:[#allocation26_spill] sm:$0xff] %v2232_v9  ;;  %1061 = vperm.xlu1 %1752, %v1947_v15   ;;  %1056 = vperm.xlu0 %1751, %v1950_v16  }
  0xf4   : > { %v2236_v10 = vpop.permute.xlu1 %525  ;;  %v2238_v11 = vpop.permute.xlu0 %520 }
  0xf5   : > { %2848 = vst [vmem:[#allocation27_spill] sm:$0xff] %v2236_v10  ;;  %2849 = vst [vmem:[#allocation28_spill] sm:$0xff] %v2238_v11  ;;  %1071 = vperm.xlu1 %1752, %v2085_v49   ;;  %1066 = vperm.xlu0 %1751, %v2088_v50  }
  0xf8   : > { %v536_v37 = vpop.permute.xlu1 %535  ;;  %v531_v14 = vpop.permute.xlu0 %530 }
  0xf9   : > { %1081 = vperm.xlu1 %1752, %v1662_v12   ;;  %1076 = vperm.xlu0 %1751, %v1661_v13  }
  0xfc   : > { %v2244_v8 = vpop.permute.xlu1 %602  ;;  %v2246_v9 = vpop.permute.xlu0 %597 }
  0xfd   : > { %1147 = vperm.xlu1 %1752, %v1965_v21   ;;  %1142 = vperm.xlu0 %1751, %v1968_v22   ;;  %v2271_v22 = vld [vmem:[%s2808_s1] ss:$0 sm:$0xff] }
  0xfe   : > { %2850 = vst [vmem:[#allocation29_spill] sm:$0xff] %v2271_v22  ;;  %v273_v13 = vmul.f32 %v2271_v22, %v2100_v54  ;;  %v2298_v11 = vmul.f32 %v2271_v22, %v2110_v57 }
 0x100   : > { %v2250_v15 = vpop.permute.xlu1 %612  ;;  %v2252_v16 = vpop.permute.xlu0 %607 }
 0x101   : > { %1157 = vperm.xlu1 %1752, %v1973_v23   ;;  %1152 = vperm.xlu0 %1751, %v1976_v24  }
 0x104   : > { %v2256_v49 = vpop.permute.xlu1 %622  ;;  %v2258_v50 = vpop.permute.xlu0 %617 }
 0x105   : > { %1167 = vperm.xlu1 %1752, %v1981_v25   ;;  %1162 = vperm.xlu0 %1751, %v1984_v26   ;;  %v2282_v25 = vld [vmem:[%s2808_s1 + $0x1] ss:$0 sm:$0xff]  ;;  %v274_v26 = vmul.f32 %v2271_v22, %v2092_v51 }
 0x106   : > { %v409_v54 = vmul.f32 %v2282_v25, %v2146_v17  ;;  %v423_v57 = vmul.f32 %v2282_v25, %v2194_v44  ;;  %v2339_v44 = vld [vmem:[%s2808_s1 + $0x2] ss:$0 sm:$0xff] }
 0x107   : > { %v558_v17 = vmul.f32 %v2339_v44, %v531_v14 }
 0x108   : > { %v2262_v12 = vpop.permute.xlu1 %632  ;;  %v2264_v21 = vpop.permute.xlu0 %627 }
 0x109   : > { %1177 = vperm.xlu1 %1752, %v1989_v27   ;;  %1172 = vperm.xlu0 %1751, %v1992_v28   ;;  %v272_v27 = vmul.f32 %v2271_v22, %v2094_v52  ;;  %v275_v28 = vmul.f32 %v2271_v22, %v2098_v53  ;;  %v2306_v52 = vmul.f32 %v2271_v22, %v2112_v58 }
 0x10a   : > { %v2310_v53 = vmul.f32 %v2271_v22, %v2116_v59  ;;  %v422_v58 = vmul.f32 %v2282_v25, %v2196_v39  ;;  %v2328_v59 = vmul.f32 %v2271_v22, %v2122_v61  ;;  %v286_v39 = vmul.f32 %v2271_v22, %v2142_v4 }
 0x10b   : > { %v413_v61 = vmul.f32 %v2282_v25, %v2158_v33  ;;  %v2357_v4 = vmul.f32 %v2271_v22, %v2128_v63  ;;  %v2362_v33 = vld [vmem:[%s2808_s1 + $0x3] ss:$0 sm:$0xff] }
 0x10c   : > { %v2273_v23 = vpop.permute.xlu1 %642  ;;  %v2275_v24 = vpop.permute.xlu0 %637 }
 0x10d   : > { %1187 = vperm.xlu1 %1752, %v1997_v29   ;;  %1182 = vperm.xlu0 %1751, %v2000_v30   ;;  %v277_v29 = vmul.f32 %v2271_v22, %v2104_v55  ;;  %v276_v30 = vmul.f32 %v2271_v22, %v2106_v56  ;;  %v2318_v55 = vmul.f32 %v2271_v22, %v2118_v60 }
 0x10e   : > { %v408_v56 = vmul.f32 %v2282_v25, %v2148_v18  ;;  %v410_v60 = vmul.f32 %v2282_v25, %v2154_v20  ;;  %v2353_v20 = vmul.f32 %v2271_v22, %v2124_v62  ;;  %2856 = vst [vmem:[#allocation35_spill] sm:$0xff] %v2357_v4  ;;  %v545_v62 = vmul.f32 %v2339_v44, %v2200_v46 }
 0x10f   : > { %v681_v46 = vmul.f32 %v2362_v33, %v2246_v9  ;;  %v2389_v9 = vld [vmem:[%s2808_s1 + $0x4] ss:$0 sm:$0xff] }
 0x110   : > { %v2300_v51 = vpop.permute.xlu1 %652  ;;  %v2302_v10 = vpop.permute.xlu0 %647  ;;  %2855 = vst [vmem:[#allocation34_spill] sm:$0xff] %v2353_v20  ;;  %v426_v4 = vadd.f32 %v410_v60, %v274_v26 }
 0x111   : > { %2851 = vst [vmem:[#allocation30_spill] sm:$0xff] %v2300_v51  ;;  %2852 = vst [vmem:[#allocation31_spill] sm:$0xff] %v2302_v10  ;;  %1197 = vperm.xlu1 %1752, %v2005_v31   ;;  %1192 = vperm.xlu0 %1751, %v2008_v32   ;;  %v287_v31 = vmul.f32 %v2271_v22, %v2140_v3  ;;  %v411_v32 = vmul.f32 %v2282_v25, %v2152_v19  ;;  %v1679_v51 = vld [vmem:[%s1894_s28 + $0xd9] sm:$0xff] }
 0x112   : > { %v559_v3 = vmul.f32 %v2339_v44, %v536_v37  ;;  %v425_v10 = vadd.f32 %v409_v54, %v273_v13  ;;  %v424_v37 = vadd.f32 %v408_v56, %v272_v27  ;;  %v412_v13 = vmul.f32 %v2282_v25, %v2160_v34 }
 0x113   : > { %v439_v14 = vadd.f32 %v423_v57, %v287_v31  ;;  %v427_v63 = vadd.f32 %v411_v32, %v275_v28  ;;  %v544_v54 = vmul.f32 %v2339_v44, %v2202_v45  ;;  %v429_v22 = vadd.f32 %v413_v61, %v277_v29 }
 0x114   : > { %v2347_v18 = vpop.permute.xlu1 %662  ;;  %v2349_v19 = vpop.permute.xlu0 %657  ;;  %v415_v45 = vmul.f32 %v2282_v25, %v2164_v0  ;;  %v561_v34 = vadd.f32 %v545_v62, %v425_v10  ;;  %v547_v29 = vmul.f32 %v2339_v44, %v2206_v48  ;;  %v428_v57 = vadd.f32 %v412_v13, %v276_v30 }
 0x115   : > { %2853 = vst [vmem:[#allocation32_spill] sm:$0xff] %v2347_v18  ;;  %2854 = vst [vmem:[#allocation33_spill] sm:$0xff] %v2349_v19  ;;  %1207 = vperm.xlu1 %1752, %v2135_v1   ;;  %1202 = vperm.xlu0 %1751, %v2138_v2   ;;  %v438_v19 = vadd.f32 %v422_v58, %v286_v39  ;;  %v1680_v18 = vld [vmem:[%s1894_s28 + $0xe1] sm:$0xff]  ;;  %v575_v1 = vadd.f32 %v559_v3, %v439_v14 }
 0x116   : > { %v682_v2 = vmul.f32 %v2362_v33, %v2244_v8  ;;  %v546_v8 = vmul.f32 %v2339_v44, %v2208_v47  ;;  %v560_v58 = vadd.f32 %v544_v54, %v424_v37  ;;  %v414_v0 = vmul.f32 %v2282_v25, %v2166_v35  ;;  %v2857_v3 = vld [vmem:[#allocation7_spill] sm:$0xff] }
 0x117   : > { %v574_v20 = vadd.f32 %v558_v17, %v438_v19  ;;  %v684_v48 = vmul.f32 %v2362_v33, %v2250_v15  ;;  %v683_v47 = vmul.f32 %v2362_v33, %v2252_v16  ;;  %v2858_v17 = vld [vmem:[#allocation8_spill] sm:$0xff]  ;;  %v431_v35 = vadd.f32 %v415_v45, %v2298_v11 }
 0x118   : > { %v673_v27 = vpop.permute.xlu1 %672  ;;  %v668_v56 = vpop.permute.xlu0 %667  ;;  %v698_v10 = vadd.f32 %v682_v2, %v561_v34  ;;  %v697_v39 = vadd.f32 %v681_v46, %v560_v58  ;;  %v562_v19 = vadd.f32 %v546_v8, %v426_v4  ;;  %v549_v15 = vmul.f32 %v2339_v44, %v2212_v41  ;;  %v2860_v2 = vld [vmem:[#allocation10_spill] sm:$0xff]  ;;  %v2861_v45 = vld [vmem:[#allocation20_spill] sm:$0xff]  ;;  %v2862_v58 = vld [vmem:[#allocation11_spill] sm:$0xff] }
 0x119   : > { %v696_v28 = vmul.f32 %v2362_v33, %v673_v27  ;;  %v695_v26 = vmul.f32 %v2362_v33, %v668_v56  ;;  %1217 = vperm.xlu1 %1752, %v1680_v18   ;;  %1212 = vperm.xlu0 %1751, %v1679_v51   ;;  %v563_v18 = vadd.f32 %v547_v29, %v427_v63 }
 0x11a   : > { %v417_v16 = vmul.f32 %v2282_v25, %v2170_v36  ;;  %v430_v62 = vadd.f32 %v414_v0, %v2306_v52  ;;  %v699_v54 = vadd.f32 %v683_v47, %v562_v19  ;;  %v686_v11 = vmul.f32 %v2362_v33, %v2256_v49  ;;  %v2863_v0 = vld [vmem:[#allocation12_spill] sm:$0xff]  ;;  %v2865_v19 = vld [vmem:[#allocation14_spill] sm:$0xff] }
 0x11b   : > { %v2391_v31 = vadd.f32 %v696_v28, %v575_v1  ;;  %v2393_v51 = vadd.f32 %v695_v26, %v574_v20  ;;  %v548_v20 = vmul.f32 %v2339_v44, %v2214_v42  ;;  %v700_v13 = vadd.f32 %v684_v48, %v563_v18  ;;  %v2859_v1 = vld [vmem:[#allocation9_spill] sm:$0xff] }
 0x11c   : > { %v739_v32 = vpop.permute.xlu1 %738  ;;  %v734_v60 = vpop.permute.xlu0 %733  ;;  %v685_v41 = vmul.f32 %v2362_v33, %v2258_v50  ;;  %v416_v52 = vmul.f32 %v2282_v25, %v2172_v38  ;;  %v565_v27 = vadd.f32 %v549_v15, %v429_v22  ;;  %v551_v49 = vmul.f32 %v2339_v44, %v2218_v43  ;;  %v2864_v18 = vld [vmem:[#allocation13_spill] sm:$0xff]  ;;  %v2866_v15 = vld [vmem:[#allocation34_spill] sm:$0xff] }
 0x11d   : > { %v818_v30 = vmul.f32 %v2389_v9, %v739_v32  ;;  %v817_v61 = vmul.f32 %v2389_v9, %v734_v60  ;;  %1283 = vperm.xlu1 %1752, %v2857_v3   ;;  %1278 = vperm.xlu0 %1751, %v2858_v17   ;;  %v550_v56 = vmul.f32 %v2339_v44, %v2220_v5 }
 0x11e   : > { %v433_v50 = vadd.f32 %v417_v16, %v2310_v53  ;;  %v564_v46 = vadd.f32 %v548_v20, %v428_v57  ;;  %v419_v34 = vmul.f32 %v2282_v25, %v2861_v45  ;;  %v702_v29 = vadd.f32 %v686_v11, %v565_v27  ;;  %v2867_v20 = vld [vmem:[#allocation25_spill] sm:$0xff] }
 0x11f   : > { %v2412_v37 = vadd.f32 %v818_v30, %v698_v10  ;;  %v2414_v14 = vadd.f32 %v817_v61, %v697_v39  ;;  %v688_v38 = vmul.f32 %v2362_v33, %v2262_v12  ;;  %v687_v43 = vmul.f32 %v2362_v33, %v2264_v21 }
 0x120   : > { %v749_v4 = vpop.permute.xlu1 %748  ;;  %v744_v63 = vpop.permute.xlu0 %743  ;;  %v701_v5 = vadd.f32 %v685_v41, %v564_v46  ;;  %v418_v10 = vmul.f32 %v2282_v25, %v2178_v40  ;;  %v567_v48 = vadd.f32 %v551_v49, %v431_v35  ;;  %v566_v47 = vadd.f32 %v550_v56, %v430_v62  ;;  %v2870_v41 = vld [vmem:[#allocation22_spill] sm:$0xff] }
 0x121   : > { %v820_v36 = vmul.f32 %v2389_v9, %v749_v4  ;;  %v819_v42 = vmul.f32 %v2389_v9, %v744_v63  ;;  %1293 = vperm.xlu1 %1752, %v2859_v1   ;;  %1288 = vperm.xlu0 %1751, %v2860_v2   ;;  %v553_v12 = vmul.f32 %v2339_v44, %v2224_v6  ;;  %v2871_v1 = vld [vmem:[#allocation30_spill] sm:$0xff] }
 0x122   : > { %v432_v21 = vadd.f32 %v416_v52, %v2318_v55  ;;  %v552_v32 = vmul.f32 %v2339_v44, %v2226_v7  ;;  %v435_v30 = vadd.f32 %v419_v34, %v2328_v59  ;;  %v704_v61 = vadd.f32 %v688_v38, %v567_v48  ;;  %v2872_v52 = vld [vmem:[#allocation31_spill] sm:$0xff] }
 0x123   : > { %v2432_v28 = vadd.f32 %v820_v36, %v700_v13  ;;  %v2434_v26 = vadd.f32 %v819_v42, %v699_v54  ;;  %v703_v3 = vadd.f32 %v687_v43, %v566_v47  ;;  %v690_v40 = vmul.f32 %v2362_v33, %v2273_v23  ;;  %v2868_v23 = vld [vmem:[#allocation26_spill] sm:$0xff]  ;;  %v2869_v54 = vld [vmem:[#allocation21_spill] sm:$0xff]  ;;  %v2873_v34 = vld [vmem:[#allocation15_spill] sm:$0xff] }
 0x124   : > { %v759_v22 = vpop.permute.xlu1 %758  ;;  %v754_v8 = vpop.permute.xlu0 %753  ;;  %v689_v6 = vmul.f32 %v2362_v33, %v2275_v24  ;;  %v434_v59 = vadd.f32 %v418_v10, %v2866_v15  ;;  %v569_v16 = vadd.f32 %v553_v12, %v433_v50  ;;  %v555_v62 = vmul.f32 %v2339_v44, %v2867_v20  ;;  %v2875_v38 = vld [vmem:[#allocation19_spill] sm:$0xff] }
 0x125   : > { %v822_v53 = vmul.f32 %v2389_v9, %v759_v22  ;;  %v821_v57 = vmul.f32 %v2389_v9, %v754_v8  ;;  %1303 = vperm.xlu1 %1752, %v2862_v58   ;;  %1298 = vperm.xlu0 %1751, %v2863_v0   ;;  %v554_v13 = vmul.f32 %v2339_v44, %v2868_v23  ;;  %v2879_v0 = vld [vmem:[#allocation28_spill] sm:$0xff] }
 0x126   : > { %v421_v24 = vmul.f32 %v2282_v25, %v2869_v54  ;;  %v568_v11 = vadd.f32 %v552_v32, %v432_v21  ;;  %v420_v36 = vmul.f32 %v2282_v25, %v2870_v41  ;;  %v706_v42 = vadd.f32 %v690_v40, %v569_v16  ;;  %v2876_v25 = vld [vmem:[#allocation29_spill] sm:$0xff]  ;;  %v2884_v54 = vld [vmem:[#allocation23_spill] sm:$0xff] }
 0x127   : > { %v2453_v60 = vadd.f32 %v822_v53, %v702_v29  ;;  %v2455_v39 = vadd.f32 %v821_v57, %v701_v5  ;;  %v692_v2 = vmul.f32 %v2362_v33, %v2871_v1  ;;  %v691_v27 = vmul.f32 %v2362_v33, %v2872_v52  ;;  %v2874_v29 = vld [vmem:[#allocation16_spill] sm:$0xff]  ;;  %v2877_v5 = vld [vmem:[#allocation27_spill] sm:$0xff] }
 0x128   : > { %v769_v17 = vpop.permute.xlu1 %768  ;;  %v764_v35 = vpop.permute.xlu0 %763  ;;  %v705_v50 = vadd.f32 %v689_v6, %v568_v11  ;;  %v284_v43 = vmul.f32 %v2876_v25, %v2875_v38  ;;  %v571_v22 = vadd.f32 %v555_v62, %v435_v30  ;;  %v570_v8 = vadd.f32 %v554_v13, %v434_v59  ;;  %v2878_v57 = vld [vmem:[#allocation35_spill] sm:$0xff] }
 0x129   : > { %v824_v55 = vmul.f32 %v2389_v9, %v769_v17  ;;  %v823_v7 = vmul.f32 %v2389_v9, %v764_v35  ;;  %1313 = vperm.xlu1 %1752, %v2864_v18   ;;  %1308 = vperm.xlu0 %1751, %v2865_v19   ;;  %v557_v53 = vmul.f32 %v2339_v44, %v2877_v5  ;;  %v2881_v17 = vld [vmem:[#allocation33_spill] sm:$0xff]  ;;  %v1698_v11 = vld [vmem:[%s1894_s28 + $0xe2] sm:$0xff]  ;;  %v1697_v41 = vld [vmem:[%s1894_s28 + $0xda] sm:$0xff] }
 0x12a   : > { %v437_v58 = vadd.f32 %v421_v24, %v2878_v57  ;;  %v556_v10 = vmul.f32 %v2339_v44, %v2879_v0  ;;  %v436_v12 = vadd.f32 %v420_v36, %v284_v43  ;;  %v708_v21 = vadd.f32 %v692_v2, %v571_v22  ;;  %v2885_v24 = vld [vmem:[#allocation24_spill] sm:$0xff] }
 0x12b   : > { %v2473_v4 = vadd.f32 %v824_v55, %v704_v61  ;;  %v2475_v63 = vadd.f32 %v823_v7, %v703_v3  ;;  %v707_v32 = vadd.f32 %v691_v27, %v570_v8  ;;  %v2880_v61 = vld [vmem:[#allocation32_spill] sm:$0xff]  ;;  %v693_v35 = vmul.f32 %v2362_v33, %v2881_v17  ;;  %v2882_v55 = vld [vmem:[#allocation17_spill] sm:$0xff]  ;;  %v2883_v7 = vld [vmem:[#allocation18_spill] sm:$0xff] }
 0x12c   : > { %v779_v49 = vpop.permute.xlu1 %778  ;;  %v774_v56 = vpop.permute.xlu0 %773  ;;  %v694_v3 = vmul.f32 %v2362_v33, %v2880_v61  ;;  %v573_v18 = vadd.f32 %v557_v53, %v437_v58  ;;  %v572_v19 = vadd.f32 %v556_v10, %v436_v12 }
 0x12d   : > { %v826_v46 = vmul.f32 %v2389_v9, %v779_v49  ;;  %v825_v45 = vmul.f32 %v2389_v9, %v774_v56  ;;  %1323 = vperm.xlu1 %1752, %v2873_v34   ;;  %1318 = vperm.xlu0 %1751, %v2874_v29   ;;  %v1646_v49 = vld [vmem:[%s2808_s1 + $0x5] ss:$0 sm:$0xff] }
 0x12e   : > { %v710_v16 = vadd.f32 %v694_v3, %v573_v18  ;;  %v709_v23 = vadd.f32 %v693_v35, %v572_v19 }
 0x12f   : > { %v2494_v48 = vadd.f32 %v826_v46, %v706_v42  ;;  %v2496_v47 = vadd.f32 %v825_v45, %v705_v50 }
 0x130   : > { %v789_v30 = vpop.permute.xlu1 %788  ;;  %v784_v40 = vpop.permute.xlu0 %783 }
 0x131   : > { %v828_v6 = vmul.f32 %v2389_v9, %v789_v30  ;;  %v827_v44 = vmul.f32 %v2389_v9, %v784_v40  ;;  %1333 = vperm.xlu1 %1752, %v2882_v55   ;;  %1328 = vperm.xlu0 %1751, %v2883_v7  }
 0x133   : > { %v844_v15 = vadd.f32 %v828_v6, %v708_v21  ;;  %v843_v59 = vadd.f32 %v827_v44, %v707_v32 }
 0x134   : > { %v799_v20 = vpop.permute.xlu1 %798  ;;  %v794_v62 = vpop.permute.xlu0 %793 }
 0x135   : > { %v830_v33 = vmul.f32 %v2389_v9, %v799_v20  ;;  %v829_v13 = vmul.f32 %v2389_v9, %v794_v62  ;;  %1343 = vperm.xlu1 %1752, %v2884_v54   ;;  %1338 = vperm.xlu0 %1751, %v2885_v24  }
 0x137   : > { %v846_v36 = vadd.f32 %v830_v33, %v710_v16  ;;  %v845_v42 = vadd.f32 %v829_v13, %v709_v23 }
 0x138   : > { %v809_v1 = vpop.permute.xlu1 %808  ;;  %v804_v2 = vpop.permute.xlu0 %803 }
 0x139   : > { %v832_v52 = vmul.f32 %v2389_v9, %v809_v1  ;;  %v831_v27 = vmul.f32 %v2389_v9, %v804_v2  ;;  %1353 = vperm.xlu1 %1752, %v1698_v11   ;;  %1348 = vperm.xlu0 %1751, %v1697_v41  }
 0x13b   : > { %v848_v56 = vadd.f32 %v832_v52, %v2391_v31  ;;  %v847_v50 = vadd.f32 %v831_v27, %v2393_v51 }
 0x13c   : > { %v875_v46 = vpop.permute.xlu1 %874  ;;  %v870_v45 = vpop.permute.xlu0 %869 }
 0x13d   : > { %v954_v34 = vmul.f32 %v1646_v49, %v875_v46  ;;  %v953_v29 = vmul.f32 %v1646_v49, %v870_v45 }
 0x13f   : > { %v2520_v38 = vadd.f32 %v954_v34, %v2412_v37  ;;  %v2523_v25 = vadd.f32 %v953_v29, %v2414_v14 }
 0x140   : > { %v885_v9 = vpop.permute.xlu1 %884  ;;  %v880_v43 = vpop.permute.xlu0 %879 }
 0x141   : > { %v956_v22 = vmul.f32 %v1646_v49, %v885_v9  ;;  %v955_v8 = vmul.f32 %v1646_v49, %v880_v43 }
 0x143   : > { %v2526_v5 = vadd.f32 %v956_v22, %v2432_v28  ;;  %v2529_v31 = vadd.f32 %v955_v8, %v2434_v26 }
 0x144   : > { %v895_v51 = vpop.permute.xlu1 %894  ;;  %v890_v53 = vpop.permute.xlu0 %889 }
 0x145   : > { %v958_v57 = vmul.f32 %v1646_v49, %v895_v51  ;;  %v957_v58 = vmul.f32 %v1646_v49, %v890_v53 }
 0x147   : > { %v2532_v37 = vadd.f32 %v958_v57, %v2453_v60  ;;  %v2535_v14 = vadd.f32 %v957_v58, %v2455_v39 }
 0x148   : > { %v905_v0 = vpop.permute.xlu1 %904  ;;  %v900_v10 = vpop.permute.xlu0 %899 }
 0x149   : > { %v960_v12 = vmul.f32 %v1646_v49, %v905_v0  ;;  %v959_v21 = vmul.f32 %v1646_v49, %v900_v10  ;;  %v2592_v0 = vld [vmem:[%s2808_s1 + $0x6] ss:$0 sm:$0xff] }
 0x14b   : > { %v2538_v28 = vadd.f32 %v960_v12, %v2473_v4  ;;  %v2541_v26 = vadd.f32 %v959_v21, %v2475_v63  ;;  %v2601_v21 = vld [vmem:[%s2808_s1 + $0x7] ss:$0 sm:$0xff] }
 0x14c   : > { %v915_v32 = vpop.permute.xlu1 %914  ;;  %v910_v61 = vpop.permute.xlu0 %909 }
 0x14d   : > { %v962_v3 = vmul.f32 %v1646_v49, %v915_v32  ;;  %v961_v30 = vmul.f32 %v1646_v49, %v910_v61 }
 0x14f   : > { %v2544_v60 = vadd.f32 %v962_v3, %v2494_v48  ;;  %v2547_v39 = vadd.f32 %v961_v30, %v2496_v47 }
 0x150   : > { %v925_v40 = vpop.permute.xlu1 %924  ;;  %v920_v17 = vpop.permute.xlu0 %919 }
 0x151   : > { %v964_v35 = vmul.f32 %v1646_v49, %v925_v40  ;;  %v963_v6 = vmul.f32 %v1646_v49, %v920_v17 }
 0x153   : > { %v2549_v44 = vadd.f32 %v964_v35, %v844_v15  ;;  %v2551_v4 = vadd.f32 %v963_v6, %v843_v59 }
 0x154   : > { %v935_v63 = vpop.permute.xlu1 %934  ;;  %v930_v55 = vpop.permute.xlu0 %929 }
 0x155   : > { %v966_v7 = vmul.f32 %v1646_v49, %v935_v63  ;;  %v965_v18 = vmul.f32 %v1646_v49, %v930_v55  ;;  %v2616_v63 = vld [vmem:[%s2808_s1 + $0x8] ss:$0 sm:$0xff] }
 0x157   : > { %v2553_v19 = vadd.f32 %v966_v7, %v846_v36  ;;  %v2555_v16 = vadd.f32 %v965_v18, %v845_v42 }
 0x158   : > { %v945_v48 = vpop.permute.xlu1 %944  ;;  %v940_v20 = vpop.permute.xlu0 %939 }
 0x159   : > { %v968_v47 = vmul.f32 %v1646_v49, %v945_v48  ;;  %v967_v62 = vmul.f32 %v1646_v49, %v940_v20 }
 0x15b   : > { %v2557_v23 = vadd.f32 %v968_v47, %v848_v56  ;;  %v2559_v33 = vadd.f32 %v967_v62, %v847_v50 }
 0x15c   : > { %v1012_v15 = vpop.permute.xlu1 %1011  ;;  %v1007_v13 = vpop.permute.xlu0 %1006 }
 0x15d   : > { %v1091_v32 = vmul.f32 %v2592_v0, %v1012_v15  ;;  %v1090_v61 = vmul.f32 %v2592_v0, %v1007_v13 }
 0x15f   : > { %v1107_v55 = vadd.f32 %v1091_v32, %v2520_v38  ;;  %v1106_v7 = vadd.f32 %v1090_v61, %v2523_v25 }
 0x160   : > { %v1022_v59 = vpop.permute.xlu1 %1021  ;;  %v1017_v54 = vpop.permute.xlu0 %1016 }
 0x161   : > { %v1093_v35 = vmul.f32 %v2592_v0, %v1022_v59  ;;  %v1092_v6 = vmul.f32 %v2592_v0, %v1017_v54 }
 0x163   : > { %v1109_v54 = vadd.f32 %v1093_v35, %v2526_v5 }
 0x164   : > { %v1032_v24 = vpop.permute.xlu1 %1031  ;;  %v1027_v11 = vpop.permute.xlu0 %1026 }
 0x165   : > { %v1095_v38 = vmul.f32 %v2592_v0, %v1032_v24  ;;  %v1094_v25 = vmul.f32 %v2592_v0, %v1027_v11 }
 0x168   : > { %v2561_v41 = vpop.permute.xlu1 %1041  ;;  %v2563_v36 = vpop.permute.xlu0 %1036 }
 0x16c   : > { %v2565_v42 = vpop.permute.xlu1 %1051  ;;  %v2567_v1 = vpop.permute.xlu0 %1046 }
 0x170   : > { %v2569_v2 = vpop.permute.xlu1 %1061  ;;  %v2571_v52 = vpop.permute.xlu0 %1056 }
 0x174   : > { %v2573_v27 = vpop.permute.xlu1 %1071  ;;  %v2575_v49 = vpop.permute.xlu0 %1066 }
 0x178   : > { %v2577_v56 = vpop.permute.xlu1 %1081  ;;  %v2579_v50 = vpop.permute.xlu0 %1076 }
 0x17c   : > { %v1148_v46 = vpop.permute.xlu1 %1147  ;;  %v1143_v45 = vpop.permute.xlu0 %1142 }
 0x17d   : > { %v1227_v40 = vmul.f32 %v2601_v21, %v1148_v46  ;;  %v1226_v17 = vmul.f32 %v2601_v21, %v1143_v45  ;;  %v1108_v46 = vadd.f32 %v1092_v6, %v2529_v31  ;;  %v2631_v45 = vld [vmem:[%s2809_s2] ss:$0 sm:$0xff] }
 0x17f   : > { %v1243_v62 = vadd.f32 %v1227_v40, %v1107_v55  ;;  %v1242_v15 = vadd.f32 %v1226_v17, %v1106_v7  ;;  %v1111_v55 = vadd.f32 %v1095_v38, %v2532_v37  ;;  %v1110_v7 = vadd.f32 %v1094_v25, %v2535_v14 }
 0x180   : > { %v1158_v34 = vpop.permute.xlu1 %1157  ;;  %v1153_v29 = vpop.permute.xlu0 %1152  ;;  %v1098_v25 = vmul.f32 %v2592_v0, %v2567_v1 }
 0x181   : > { %v1229_v18 = vmul.f32 %v2601_v21, %v1158_v34  ;;  %v1228_v48 = vmul.f32 %v2601_v21, %v1153_v29 }
 0x183   : > { %v1245_v32 = vadd.f32 %v1229_v18, %v1109_v54  ;;  %v1244_v61 = vadd.f32 %v1228_v48, %v1108_v46  ;;  %v1097_v18 = vmul.f32 %v2592_v0, %v2561_v41 }
 0x184   : > { %v1168_v9 = vpop.permute.xlu1 %1167  ;;  %v1163_v43 = vpop.permute.xlu0 %1162 }
 0x185   : > { %v1231_v40 = vmul.f32 %v2601_v21, %v1168_v9  ;;  %v1230_v5 = vmul.f32 %v2601_v21, %v1163_v43  ;;  %v1096_v9 = vmul.f32 %v2592_v0, %v2563_v36  ;;  %v1113_v38 = vadd.f32 %v1097_v18, %v2538_v28 }
 0x186   : > { %v1101_v18 = vmul.f32 %v2592_v0, %v2569_v2  ;;  %v1103_v2 = vmul.f32 %v2592_v0, %v2573_v27 }
 0x188   : > { %v1178_v22 = vpop.permute.xlu1 %1177  ;;  %v1173_v8 = vpop.permute.xlu0 %1172 }
 0x18c   : > { %v2581_v51 = vpop.permute.xlu1 %1187  ;;  %v2583_v53 = vpop.permute.xlu0 %1182 }
 0x18d   : > { %v1234_v28 = vmul.f32 %v2601_v21, %v2583_v53 }
 0x190   : > { %v2585_v57 = vpop.permute.xlu1 %1197  ;;  %v2587_v58 = vpop.permute.xlu0 %1192 }
 0x194   : > { %v2594_v10 = vpop.permute.xlu1 %1207  ;;  %v2596_v12 = vpop.permute.xlu0 %1202 }
 0x195   : > { %v1239_v27 = vmul.f32 %v2601_v21, %v2594_v10 }
 0x198   : > { %v2605_v3 = vpop.permute.xlu1 %1217  ;;  %v2607_v30 = vpop.permute.xlu0 %1212 }
 0x19c   : > { %v1284_v20 = vpop.permute.xlu1 %1283  ;;  %v1279_v47 = vpop.permute.xlu0 %1278 }
 0x19d   : > { %v1363_v13 = vmul.f32 %v2616_v63, %v1284_v20  ;;  %v1362_v59 = vmul.f32 %v2616_v63, %v1279_v47 }
 0x19f   : > { %v1379_v34 = vadd.f32 %v1363_v13, %v1243_v62  ;;  %v1378_v29 = vadd.f32 %v1362_v59, %v1242_v15  ;;  %v1247_v62 = vadd.f32 %v1231_v40, %v1111_v55  ;;  %v1246_v15 = vadd.f32 %v1230_v5, %v1110_v7 }
 0x1a0   : > { %v1294_v17 = vpop.permute.xlu1 %1293  ;;  %v1289_v31 = vpop.permute.xlu0 %1288  ;;  %v1233_v13 = vmul.f32 %v2601_v21, %v1178_v22  ;;  %v1232_v59 = vmul.f32 %v2601_v21, %v1173_v8  ;;  %v1112_v22 = vadd.f32 %v1096_v9, %v2541_v26  ;;  %v1099_v8 = vmul.f32 %v2592_v0, %v2565_v42 }
 0x1a1   : > { %v1402_v24 = vadd.f32 %v2631_v45, %v1379_v34  ;;  %v1401_v11 = vadd.f32 %v2631_v45, %v1378_v29  ;;  %v1365_v35 = vmul.f32 %v2616_v63, %v1294_v17  ;;  %v1364_v6 = vmul.f32 %v2616_v63, %v1289_v31 }
 0x1a2   : > { %v1249_v40 = vadd.f32 %v1233_v13, %v1113_v38  ;;  %v1248_v5 = vadd.f32 %v1232_v59, %v1112_v22  ;;  %v1235_v17 = vmul.f32 %v2601_v21, %v2581_v51  ;;  %v1114_v51 = vadd.f32 %v1098_v25, %v2547_v39 }
 0x1a3   : > { %v1418_v43 = vmax.f32 %v1402_v24, 0.0  ;;  %v1417_v48 = vmax.f32 %v1401_v11, 0.0  ;;  %v1381_v20 = vadd.f32 %v1365_v35, %v1245_v32  ;;  %v1380_v47 = vadd.f32 %v1364_v6, %v1244_v61 }
 0x1a4   : > { %v1304_v54 = vpop.permute.xlu1 %1303  ;;  %v1299_v37 = vpop.permute.xlu0 %1298  ;;  %v1115_v35 = vadd.f32 %v1099_v8, %v2544_v60  ;;  %v1100_v9 = vmul.f32 %v2592_v0, %v2571_v52  ;;  %v1102_v52 = vmul.f32 %v2592_v0, %v2575_v49  ;;  %v1237_v13 = vmul.f32 %v2601_v21, %v2585_v57 }
 0x1a5   : > { %1435 = vst.msk [vmem:[#allocation2 + $0x8] sm:$0xff] %vm1433_vm0, %v1418_v43  ;;  %1434 = vst.msk [vmem:[#allocation2] sm:$0xff] %vm1433_vm0, %v1417_v48  ;;  %v1404_v14 = vadd.f32 %v2631_v45, %v1381_v20  ;;  %v1403_v41 = vadd.f32 %v2631_v45, %v1380_v47  ;;  %v1367_v36 = vmul.f32 %v2616_v63, %v1304_v54 }
 0x1a6   : > { %v1366_v46 = vmul.f32 %v2616_v63, %v1299_v37  ;;  %v1251_v43 = vadd.f32 %v1235_v17, %v1115_v35  ;;  %v1250_v48 = vadd.f32 %v1234_v28, %v1114_v51  ;;  %v1236_v59 = vmul.f32 %v2601_v21, %v2587_v58 }
 0x1a7   : > { %v1420_v34 = vmax.f32 %v1404_v14, 0.0  ;;  %v1419_v29 = vmax.f32 %v1403_v41, 0.0  ;;  %v1383_v32 = vadd.f32 %v1367_v36, %v1247_v62  ;;  %v1116_v38 = vadd.f32 %v1100_v9, %v2551_v4 }
 0x1a8   : > { %v1382_v61 = vadd.f32 %v1366_v46, %v1246_v15  ;;  %v1314_v31 = vpop.permute.xlu1 %1313  ;;  %v1309_v26 = vpop.permute.xlu0 %1308  ;;  %v1117_v46 = vadd.f32 %v1101_v18, %v2549_v44  ;;  %v1238_v49 = vmul.f32 %v2601_v21, %v2596_v12 }
 0x1a9   : > { %1437 = vst.msk [vmem:[#allocation2 + $0x18] sm:$0xff] %vm1433_vm0, %v1420_v34  ;;  %1436 = vst.msk [vmem:[#allocation2 + $0x10] sm:$0xff] %vm1433_vm0, %v1419_v29  ;;  %v1406_v42 = vadd.f32 %v2631_v45, %v1383_v32  ;;  %v1369_v24 = vmul.f32 %v2616_v63, %v1314_v31  ;;  %v1368_v11 = vmul.f32 %v2616_v63, %v1309_v26 }
 0x1aa   : > { %v1405_v1 = vadd.f32 %v2631_v45, %v1382_v61  ;;  %v1253_v32 = vadd.f32 %v1237_v13, %v1117_v46  ;;  %v1252_v10 = vadd.f32 %v1236_v59, %v1116_v38  ;;  %v1105_v31 = vmul.f32 %v2592_v0, %v2577_v56 }
 0x1ab   : > { %v1422_v6 = vmax.f32 %v1406_v42, 0.0  ;;  %v1385_v55 = vadd.f32 %v1369_v24, %v1249_v40  ;;  %v1384_v7 = vadd.f32 %v1368_v11, %v1248_v5  ;;  %v1119_v40 = vadd.f32 %v1103_v2, %v2553_v19 }
 0x1ac   : > { %v1421_v53 = vmax.f32 %v1405_v1, 0.0  ;;  %v1324_v20 = vpop.permute.xlu1 %1323  ;;  %v1319_v47 = vpop.permute.xlu0 %1318  ;;  %v1451_v54 = vld [vmem:[#allocation2 + $0x8] sm:$0xff]  ;;  %v1450_v22 = vld [vmem:[#allocation2] sm:$0xff]  ;;  %v1118_v5 = vadd.f32 %v1102_v52, %v2555_v16  ;;  %v1104_v26 = vmul.f32 %v2592_v0, %v2579_v50  ;;  %v1241_v56 = vmul.f32 %v2601_v21, %v2605_v3 }
 0x1ad   : > { %1439 = vst.msk [vmem:[#allocation2 + $0x28] sm:$0xff] %vm1433_vm0, %v1422_v6  ;;  %v1408_v60 = vadd.f32 %v2631_v45, %v1385_v55  ;;  %v1407_v39 = vadd.f32 %v2631_v45, %v1384_v7  ;;  %v1371_v62 = vmul.f32 %v2616_v63, %v1324_v20  ;;  %v1370_v15 = vmul.f32 %v2616_v63, %v1319_v47 }
 0x1ae   : > { %1438 = vst.msk [vmem:[#allocation2 + $0x20] sm:$0xff] %vm1433_vm0, %v1421_v53  ;;  %v1255_v19 = vadd.f32 %v1239_v27, %v1119_v40  ;;  %v1254_v16 = vadd.f32 %v1238_v49, %v1118_v5  ;;  %v1240_v50 = vmul.f32 %v2601_v21, %v2607_v30  ;;  %v1121_v18 = vadd.f32 %v1105_v31, %v2557_v23 }
 0x1af   : > { %v1424_v37 = vmax.f32 %v1408_v60, 0.0  ;;  %v1423_v14 = vmax.f32 %v1407_v39, 0.0  ;;  %v1387_v41 = vadd.f32 %v1371_v62, %v1251_v43  ;;  %v1386_v36 = vadd.f32 %v1370_v15, %v1250_v48 }
 0x1b0   : > { %v1460_v57 = vld [vmem:[#allocation2 + $0x18] sm:$0xff]  ;;  %v1459_v8 = vld [vmem:[#allocation2 + $0x10] sm:$0xff]  ;;  %v1334_v25 = vpop.permute.xlu1 %1333  ;;  %v1329_v58 = vpop.permute.xlu0 %1328  ;;  %v1120_v9 = vadd.f32 %v1104_v26, %v2559_v33  ;;  %v1257_v2 = vadd.f32 %v1241_v56, %v1121_v18 }
 0x1b1   : > { %v1468_v34 = vmax.f32 %v1451_v54, %v1460_v57  ;;  %v1467_v29 = vmax.f32 %v1450_v22, %v1459_v8  ;;  %1441 = vst.msk [vmem:[#allocation2 + $0x38] sm:$0xff] %vm1433_vm0, %v1424_v37  ;;  %1440 = vst.msk [vmem:[#allocation2 + $0x30] sm:$0xff] %vm1433_vm0, %v1423_v14  ;;  %v1410_v44 = vadd.f32 %v2631_v45, %v1387_v41 }
 0x1b2   : > { %v1409_v4 = vadd.f32 %v2631_v45, %v1386_v36  ;;  %v1373_v12 = vmul.f32 %v2616_v63, %v1334_v25  ;;  %v1372_v61 = vmul.f32 %v2616_v63, %v1329_v58  ;;  %v1256_v52 = vadd.f32 %v1240_v50, %v1120_v9 }
 0x1b3   : > { %1476 = vst.msk [vmem:[#allocation3 + $0x8] sm:$0xff] %vm1433_vm0, %v1468_v34  ;;  %1475 = vst.msk [vmem:[#allocation3] sm:$0xff] %vm1433_vm0, %v1467_v29  ;;  %v1426_v17 = vmax.f32 %v1410_v44, 0.0 }
 0x1b4   : > { %v1425_v28 = vmax.f32 %v1409_v4, 0.0  ;;  %v1389_v42 = vadd.f32 %v1373_v12, %v1253_v32  ;;  %v1388_v1 = vadd.f32 %v1372_v61, %v1252_v10  ;;  %v1344_v24 = vpop.permute.xlu1 %1343  ;;  %v1339_v11 = vpop.permute.xlu0 %1338  ;;  %v1453_v53 = vld [vmem:[#allocation2 + $0x28] sm:$0xff] }
 0x1b5   : > { %1443 = vst.msk [vmem:[#allocation2 + $0x48] sm:$0xff] %vm1433_vm0, %v1426_v17  ;;  %v1375_v35 = vmul.f32 %v2616_v63, %v1344_v24  ;;  %v1374_v51 = vmul.f32 %v2616_v63, %v1339_v11  ;;  %v1452_v43 = vld [vmem:[#allocation2 + $0x20] sm:$0xff] }
 0x1b6   : > { %1442 = vst.msk [vmem:[#allocation2 + $0x40] sm:$0xff] %vm1433_vm0, %v1425_v28  ;;  %v1412_v0 = vadd.f32 %v2631_v45, %v1389_v42  ;;  %v1411_v6 = vadd.f32 %v2631_v45, %v1388_v1 }
 0x1b7   : > { %v1391_v55 = vadd.f32 %v1375_v35, %v1255_v19  ;;  %v1390_v7 = vadd.f32 %v1374_v51, %v1254_v16 }
 0x1b8   : > { %v1462_v48 = vld [vmem:[#allocation2 + $0x38] sm:$0xff]  ;;  %v1461_v3 = vld [vmem:[#allocation2 + $0x30] sm:$0xff]  ;;  %v1428_v20 = vmax.f32 %v1412_v0, 0.0  ;;  %v1427_v47 = vmax.f32 %v1411_v6, 0.0  ;;  %v1354_v21 = vpop.permute.xlu1 %1353  ;;  %v1349_v30 = vpop.permute.xlu0 %1348 }
 0x1b9   : > { %v1470_v60 = vmax.f32 %v1453_v53, %v1462_v48  ;;  %v1469_v39 = vmax.f32 %v1452_v43, %v1461_v3  ;;  %v1414_v62 = vadd.f32 %v2631_v45, %v1391_v55  ;;  %v1413_v15 = vadd.f32 %v2631_v45, %v1390_v7 }
 0x1ba   : > { %1445 = vst.msk [vmem:[#allocation2 + $0x58] sm:$0xff] %vm1433_vm0, %v1428_v20  ;;  %1444 = vst.msk [vmem:[#allocation2 + $0x50] sm:$0xff] %vm1433_vm0, %v1427_v47  ;;  %v1377_v23 = vmul.f32 %v2616_v63, %v1354_v21  ;;  %v1376_v33 = vmul.f32 %v2616_v63, %v1349_v30  ;;  %v1483_v13 = vld [vmem:[#allocation3] ss:$2 sm:$0xff]  ;;  %v1491_v59 = vld [vmem:[#allocation3 + $0x1] ss:$2 sm:$0xff] }
 0x1bb   : > { %1478 = vst.msk [vmem:[#allocation3 + $0x18] sm:$0xff] %vm1433_vm0, %v1470_v60  ;;  %1477 = vst.msk [vmem:[#allocation3 + $0x10] sm:$0xff] %vm1433_vm0, %v1469_v39  ;;  %v1430_v54 = vmax.f32 %v1414_v62, 0.0  ;;  %v1429_v37 = vmax.f32 %v1413_v15, 0.0  ;;  %v1498_v14 = vmax.f32 %v1483_v13, %v1491_v59 }
 0x1bc   : > { %v1393_v41 = vadd.f32 %v1377_v23, %v1257_v2  ;;  %v1392_v36 = vadd.f32 %v1376_v33, %v1256_v52  ;;  %v1455_v38 = vld [vmem:[#allocation2 + $0x48] sm:$0xff] }
 0x1bd   : > { %1447 = vst.msk [vmem:[#allocation2 + $0x68] sm:$0xff] %vm1433_vm0, %v1430_v54  ;;  %1446 = vst.msk [vmem:[#allocation2 + $0x60] sm:$0xff] %vm1433_vm0, %v1429_v37  ;;  %v1454_v22 = vld [vmem:[#allocation2 + $0x40] sm:$0xff] }
 0x1be   : > { %1502 = vst.msk [vmem:[%s2737_s6] sm:$0xff] %vm1433_vm0, %v1498_v14  ;;  %v1416_v63 = vadd.f32 %v2631_v45, %v1393_v41  ;;  %v1415_v46 = vadd.f32 %v2631_v45, %v1392_v36 }
 0x1c0   : > { %v1432_v27 = vmax.f32 %v1416_v63, 0.0  ;;  %v1431_v49 = vmax.f32 %v1415_v46, 0.0 }
 0x1c1   : > { %v1464_v57 = vld [vmem:[#allocation2 + $0x58] sm:$0xff]  ;;  %v1463_v8 = vld [vmem:[#allocation2 + $0x50] sm:$0xff] }
 0x1c2   : > { %v1472_v25 = vmax.f32 %v1455_v38, %v1464_v57  ;;  %v1471_v58 = vmax.f32 %v1454_v22, %v1463_v8  ;;  %1449 = vst.msk [vmem:[#allocation2 + $0x78] sm:$0xff] %vm1433_vm0, %v1432_v27  ;;  %1448 = vst.msk [vmem:[#allocation2 + $0x70] sm:$0xff] %vm1433_vm0, %v1431_v49  ;;  %v1485_v34 = vld [vmem:[#allocation3 + $0x10] ss:$2 sm:$0xff]  ;;  %v1493_v29 = vld [vmem:[#allocation3 + $0x11] ss:$2 sm:$0xff] }
 0x1c3   : > { %v1499_v44 = vmax.f32 %v1485_v34, %v1493_v29 }
 0x1c4   : > { %1480 = vst.msk [vmem:[#allocation3 + $0x28] sm:$0xff] %vm1433_vm0, %v1472_v25  ;;  %1479 = vst.msk [vmem:[#allocation3 + $0x20] sm:$0xff] %vm1433_vm0, %v1471_v58  ;;  %v1457_v45 = vld [vmem:[#allocation2 + $0x68] sm:$0xff]  ;;  %v1456_v4 = vld [vmem:[#allocation2 + $0x60] sm:$0xff] }
 0x1c5   : > { %1503 = vst.msk [vmem:[%s2737_s6 + $0x8] sm:$0xff] %vm1433_vm0, %v1499_v44 }
 0x1c9   : > { %v1466_v32 = vld [vmem:[#allocation2 + $0x78] sm:$0xff]  ;;  %v1465_v10 = vld [vmem:[#allocation2 + $0x70] sm:$0xff] }
 0x1ca   : > { %v1474_v12 = vmax.f32 %v1457_v45, %v1466_v32  ;;  %v1473_v61 = vmax.f32 %v1456_v4, %v1465_v10 }
 0x1cb   : > { %v1487_v40 = vld [vmem:[#allocation3 + $0x20] ss:$2 sm:$0xff]  ;;  %v1495_v5 = vld [vmem:[#allocation3 + $0x21] ss:$2 sm:$0xff] }
 0x1cc   : > { %1482 = vst.msk [vmem:[#allocation3 + $0x38] sm:$0xff] %vm1433_vm0, %v1474_v12  ;;  %1481 = vst.msk [vmem:[#allocation3 + $0x30] sm:$0xff] %vm1433_vm0, %v1473_v61  ;;  %v1500_v17 = vmax.f32 %v1487_v40, %v1495_v5 }
 0x1ce   : > { %1504 = vst.msk [vmem:[%s2737_s6 + $0x10] sm:$0xff] %vm1433_vm0, %v1500_v17 }
 0x1d3   : > { %v1489_v28 = vld [vmem:[#allocation3 + $0x30] ss:$2 sm:$0xff]  ;;  %v1497_v31 = vld [vmem:[#allocation3 + $0x31] ss:$2 sm:$0xff] }
 0x1d4   : > { %v1501_v26 = vmax.f32 %v1489_v28, %v1497_v31 }
 0x1d6   : > { %1505 = vst.msk [vmem:[%s2737_s6 + $0x18] sm:$0xff] %vm1433_vm0, %v1501_v26 }
 0x1d7   : > { %1766 = shalt.err (!%p1763_p3)
}
 0x1d8   : > { %s1767_s25 = scalar_lea.hbm %s2758_s11, 512  ;;  %s1771_s28 = scalar_lea.hbm %s2810_s3, 2048 }
 0x1d9   : > { %p1768_p4 = scmp.ne.s32.totalorder %s2758_s11, %s1767_s25  ;;  %p1772_p9 = scmp.lt.u32.totalorder %s2758_s11, %s2810_s3 }
 0x1da   : > { %p1773_p10 = scmp.lt.u32.totalorder %s1771_s28, %s1767_s25  ;;  %p1775_p12 = scmp.lt.u32.totalorder %s1767_s25, %s2758_s11 }
 0x1db   : > { %p1769_p7 = pnand %p1768_p4, %p1879_p5 }
 0x1dc   : > { %p1774_p11 = por %p1773_p10, %p1772_p9 }
 0x1dd   : > { %p1770_p8 = pneg %p1769_p7 }
 0x1de   : > { %p1776_p13 = por %p1775_p12, %p1774_p11 }
 0x1e0   : > { %p1777_p0 = pnand %p1776_p13, %p1770_p8 }
 0x1e2   : > { %1780 = shalt.err (!%p1777_p0)
}
 0x1e3   : > { %s1819_s4 = smov 128   ;;  %s1820_s5 = smov 8  }
 0x1e4   : > { %1709 = dma.vmem_to_hbm [thread:$0]  (%p1879_p5), %s2760_s8, 512, %s2758_s11, %s2766_s17, %s1819_s4, %s1819_s4, %s1820_s5  }
 0x1e5 PF: > { %p1715_p1 = scmp.ge.s32.totalorder %s1815_s15, 2  ;;  %s1535_s6 = sand.u32 1, %s1803_s12  }
 0x1e6   : > { %s1536_s7 = scalar_lea.sflag [#allocation5], %s1535_s6 }
 0x1e7   : > { %p1712_p2 = pnand %p1715_p1, %p1883_p6 }
 0x1e9   : > { %1798 = dma.done.wait (!%p1712_p2), %s1536_s7, 512  }
 0x1ea   : > { %1800 = vsyncadd (!%p1712_p2), %s1536_s7, 4294966784  ;;  %p13_p3 = scmp.ge.s32.totalorder %s1866_s18, 6   ;;  %s2886_s12 = smov %s1807_s13 }
 0x1eb   : > { %s2887_s13 = smov %s1811_s14  ;;  %s2888_s14 = smov %s1877_s21 }
 0x1ec   : > { %s2889_s15 = smov %s1866_s18  ;;  %15 = sbr.rel (!%p13_p3) target bundleno = 3 (0x3), region = 85 }
 0x1f3   :  { %1541 = vsyncpa [#allocation5], 1 }
 0x1f4   :  { %1543 = vsyncpa [#allocation5 + $0x1], 1 }

</bundles_post_ra>
